<compile_context>
chip_gen: v5e
topology: v5e:2x2
jax: 0.10.0
libtpu: 0.0.40
codegen_flags: <defaults>
</compile_context>

<pallas_src>
import functools

import jax
import jax.numpy as jnp
from jax import lax
from jax.experimental import pallas as pl
from jax.experimental.pallas import tpu as pltpu


# --------------------------- fused model kernel -------------------------------

def _fused_lstm_kernel(*refs, num_layers, hidden_dim, seq_len, batch_pad):
    H, T, Bp = hidden_dim, seq_len, batch_pad

    x_ref = refs[0]                                   # (T*Bp, D_in)
    layer_refs = [refs[1 + 3 * l: 4 + 3 * l] for l in range(num_layers)]
    w_out_ref = refs[1 + 3 * num_layers]              # (H, O)
    b_out_ref = refs[2 + 3 * num_layers]              # (1, O)
    o_ref = refs[3 + 3 * num_layers]                  # (Bp, O)
    gx_scr = refs[4 + 3 * num_layers]                 # (T*Bp, 4H) hoisted input proj
    seq_scr = refs[5 + 3 * num_layers]                # (T*Bp, H) layer output sequence
    h_scr = refs[6 + 3 * num_layers]                  # (Bp, H)
    c_scr = refs[7 + 3 * num_layers]                  # (Bp, H)

    # Lane mask for the "g" gate slab (PyTorch gate order i, f, g, o).
    # Hoisted once: JAX does not CSE broadcast_in_dim inside the loop.
    lane = lax.broadcasted_iota(jnp.int32, (Bp, 4 * H), 1)
    g_slab = (lane >= 2 * H) & (lane < 3 * H)

    unroll = T <= 32  # keep code size bounded for long sequences

    for l in range(num_layers):
        w_ih_ref, w_hh_ref, b_ref = layer_refs[l]
        is_last = (l == num_layers - 1)

        # Hoisted input projection: the whole sequence in one MXU matmul.
        layer_in = x_ref[...] if l == 0 else seq_scr[...]
        gx_scr[...] = (jnp.dot(layer_in, w_ih_ref[...],
                               preferred_element_type=jnp.float32)
                       + b_ref[...])

        w_hh = w_hh_ref[...]
        h_scr[...] = jnp.zeros_like(h_scr)
        c_scr[...] = jnp.zeros_like(c_scr)

        def step(t, carry, w_hh=w_hh, is_last=is_last):
            row = pl.multiple_of(t * Bp, Bp)
            gates = (jnp.dot(h_scr[...], w_hh,
                             preferred_element_type=jnp.float32)
                     + gx_scr[pl.ds(row, Bp), :])                 # (Bp, 4H)
            # Single full-tile tanh; sigmoid(x) == 0.5*(1 + tanh(x/2)).
            # i,f,o gates get the sigmoid branch, g gets the tanh branch.
            th = jnp.tanh(jnp.where(g_slab, gates, 0.5 * gates))
            act = jnp.where(g_slab, th, 0.5 * (th + 1.0))
            i_g = act[:, 0 * H:1 * H]
            f_g = act[:, 1 * H:2 * H]
            g_g = act[:, 2 * H:3 * H]
            o_g = act[:, 3 * H:4 * H]
            c_new = f_g * c_scr[...] + i_g * g_g
            h_new = o_g * jnp.tanh(c_new)
            c_scr[...] = c_new
            h_scr[...] = h_new
            if not is_last:
                # Only intermediate layers need the full hidden sequence
                # (kept in VMEM for the next layer's hoisted projection).
                seq_scr[pl.ds(row, Bp), :] = h_new
            return carry

        lax.fori_loop(0, T, step, 0, unroll=unroll)

    # Final Linear fused on the last timestep's hidden state: (Bp, H) -> (Bp, O).
    o_ref[...] = (jnp.dot(h_scr[...], w_out_ref[...],
                          preferred_element_type=jnp.float32)
                  + b_out_ref[...]).astype(o_ref.dtype)


# ------------------------------ model wrapper ----------------------------------

def lstm_model_forward(x, layer_params, w_outT, b_out, hidden_dim):
    """x: (B, T, D_in) -> (B, output_dim). Matches LSTMModel.forward."""
    B, T, D_in = x.shape
    Bp = ((B + 7) // 8) * 8            # pad batch to a sublane multiple
    num_layers = len(layer_params)
    H = hidden_dim
    O = w_outT.shape[1]

    # time-major, batch-padded, flattened rows: row t*Bp + b == (timestep t, batch b)
    x_tm = jnp.transpose(x, (1, 0, 2))                         # (T, B, D)
    x_tm = jnp.pad(x_tm, ((0, 0), (0, Bp - B), (0, 0)))        # (T, Bp, D)
    x_flat = x_tm.reshape(T * Bp, D_in)

    args = [x_flat]
    for (w_ihT, w_hhT, b) in layer_params:
        args += [w_ihT, w_hhT, b]
    args += [w_outT, b_out]

    kernel = functools.partial(
        _fused_lstm_kernel, num_layers=num_layers, hidden_dim=H,
        seq_len=T, batch_pad=Bp)

    # Scratch + resident params; raise the scoped VMEM limit only if needed.
    scratch_bytes = 4 * (T * Bp * 4 * H + T * Bp * H + 2 * Bp * H)
    param_bytes = 4 * sum(int(a.size) for a in args) + 4 * Bp * O
    vmem_needed = scratch_bytes + param_bytes
    compiler_params = None
    if vmem_needed > 12 * 1024 * 1024:
        compiler_params = pltpu.CompilerParams(
            vmem_limit_bytes=min(int(vmem_needed * 1.5) + (2 << 20), 60 << 20))

    out_pad = pl.pallas_call(
        kernel,
        out_shape=jax.ShapeDtypeStruct((Bp, O), jnp.float32),
        scratch_shapes=[
            pltpu.VMEM((T * Bp, 4 * H), jnp.float32),   # hoisted gate projections
            pltpu.VMEM((T * Bp, H), jnp.float32),       # intermediate hidden sequence
            pltpu.VMEM((Bp, H), jnp.float32),           # h carry
            pltpu.VMEM((Bp, H), jnp.float32),           # c carry
        ],
        compiler_params=compiler_params,
    )(*args)
    return out_pad[:B]


# ------------------------- deterministic parameter init ------------------------

def init_params(key, input_dim, hidden_dim, num_layers, output_dim):
    bound = 1.0 / float(hidden_dim) ** 0.5
    layers = []
    for l in range(num_layers):
        d_in = input_dim if l == 0 else hidden_dim
        key, k1, k2, k3, k4 = jax.random.split(key, 5)
        w_ih = jax.random.uniform(k1, (4 * hidden_dim, d_in), jnp.float32, -bound, bound)
        w_hh = jax.random.uniform(k2, (4 * hidden_dim, hidden_dim), jnp.float32, -bound, bound)
        b_ih = jax.random.uniform(k3, (4 * hidden_dim,), jnp.float32, -bound, bound)
        b_hh = jax.random.uniform(k4, (4 * hidden_dim,), jnp.float32, -bound, bound)
        layers.append((w_ih.T, w_hh.T, (b_ih + b_hh)[None, :]))
    key, k5, k6 = jax.random.split(key, 3)
    lin_bound = 1.0 / float(hidden_dim) ** 0.5
    w_out = jax.random.uniform(k5, (output_dim, hidden_dim), jnp.float32, -lin_bound, lin_bound)
    b_out = jax.random.uniform(k6, (output_dim,), jnp.float32, -lin_bound, lin_bound)
    return layers, w_out.T, b_out[None, :]


# ------------------------------ pure-JAX reference ------------------------------

def ref_forward(x, layer_params, w_outT, b_out, hidden_dim):
    B = x.shape[0]
    seq = jnp.transpose(x, (1, 0, 2))
    for (w_ihT, w_hhT, b) in layer_params:
        def step(carry, xt):
            h, c = carry
            gates = xt @ w_ihT + h @ w_hhT + b
            i, f, g, o = jnp.split(gates, 4, axis=-1)
            c = jax.nn.sigmoid(f) * c + jax.nn.sigmoid(i) * jnp.tanh(g)
            h = jax.nn.sigmoid(o) * jnp.tanh(c)
            return (h, c), h
        h0 = jnp.zeros((B, hidden_dim), jnp.float32)
        (_, _), hs = lax.scan(step, (h0, h0), seq)
        seq = hs
    return seq[-1] @ w_outT + b_out


# ----------------------------------- main ---------------------------------------

if __name__ == "__main__":
    batch, seq_len = 2, 8
    input_dim, hidden_dim, num_layers, output_dim = 16, 32, 2, 4

    key = jax.random.PRNGKey(0)
    key, xk = jax.random.split(key)
    x = jax.random.normal(xk, (batch, seq_len, input_dim), jnp.float32)

    layer_params, w_outT, b_out = init_params(
        key, input_dim, hidden_dim, num_layers, output_dim)

    fwd = jax.jit(functools.partial(lstm_model_forward, hidden_dim=hidden_dim))
    out = jax.block_until_ready(fwd(x, layer_params, w_outT, b_out))
    assert out.shape == (batch, output_dim)

    ref = jax.block_until_ready(
        ref_forward(x, layer_params, w_outT, b_out, hidden_dim))
    assert jnp.allclose(out, ref, atol=1e-5, rtol=1e-5), (out, ref)

    print("KERNEL_OK")
</pallas_src>

<mosaic_0001>
module attributes {stable_mosaic.version = 11 : i64} {
  func.func @_fused_lstm_kernel(%arg0: memref<64x16xf32, #tpu.memory_space<vmem>>, %arg1: memref<16x128xf32, #tpu.memory_space<vmem>>, %arg2: memref<32x128xf32, #tpu.memory_space<vmem>>, %arg3: memref<1x128xf32, #tpu.memory_space<vmem>>, %arg4: memref<32x128xf32, #tpu.memory_space<vmem>>, %arg5: memref<32x128xf32, #tpu.memory_space<vmem>>, %arg6: memref<1x128xf32, #tpu.memory_space<vmem>>, %arg7: memref<32x4xf32, #tpu.memory_space<vmem>>, %arg8: memref<1x4xf32, #tpu.memory_space<vmem>>, %arg9: memref<8x4xf32, #tpu.memory_space<vmem>>, %arg10: memref<64x128xf32, #tpu.memory_space<vmem>>, %arg11: memref<64x32xf32, #tpu.memory_space<vmem>>, %arg12: memref<8x32xf32, #tpu.memory_space<vmem>>, %arg13: memref<8x32xf32, #tpu.memory_space<vmem>>) attributes {dimension_semantics = [], scalar_prefetch = 0 : i64, scratch_operands = 4 : i64, tpu.core_type = #tpu.core_type<tc>} {
    %0 = tpu.iota {dimensions = array<i32: 1>} : vector<8x128xi32>
    %c64_i32 = arith.constant 64 : i32
    %1 = vector.broadcast %c64_i32 : i32 to vector<8x128xi32>
    %2 = arith.cmpi sge, %0, %1 : vector<8x128xi32>
    %c96_i32 = arith.constant 96 : i32
    %3 = vector.broadcast %c96_i32 : i32 to vector<8x128xi32>
    %4 = arith.cmpi slt, %0, %3 : vector<8x128xi32>
    %5 = arith.andi %2, %4 : vector<8x128xi1>
    %c0 = arith.constant 0 : index
    %c0_0 = arith.constant 0 : index
    %6 = vector.load %arg0[%c0, %c0_0] : memref<64x16xf32, #tpu.memory_space<vmem>>, vector<64x16xf32>
    %c0_1 = arith.constant 0 : index
    %c0_2 = arith.constant 0 : index
    %7 = vector.load %arg1[%c0_1, %c0_2] : memref<16x128xf32, #tpu.memory_space<vmem>>, vector<16x128xf32>
    %cst = arith.constant dense<0.000000e+00> : vector<64x128xf32>
    %8 = tpu.matmul %6, %7, %cst {dimension_numbers = #tpu.dot_dimension_numbers<[1], [0], [0], [1], [0, 0, 1, 1], [], []>} : vector<64x16xf32>, vector<16x128xf32>, vector<64x128xf32> -> vector<64x128xf32>
    %c0_3 = arith.constant 0 : index
    %c0_4 = arith.constant 0 : index
    %9 = vector.load %arg3[%c0_3, %c0_4] : memref<1x128xf32, #tpu.memory_space<vmem>>, vector<1x128xf32>
    %10 = vector.broadcast %9 : vector<1x128xf32> to vector<64x128xf32>
    %11 = arith.addf %8, %10 : vector<64x128xf32>
    %c0_5 = arith.constant 0 : index
    %c0_6 = arith.constant 0 : index
    %12 = vector.load %arg10[%c0_5, %c0_6] : memref<64x128xf32, #tpu.memory_space<vmem>>, vector<64x128xf32>
    tpu.vector_store %arg10[%c0_5, %c0_6], %11 {strides = array<i32>} : memref<64x128xf32, #tpu.memory_space<vmem>>, vector<64x128xf32>,
    %c0_7 = arith.constant 0 : index
    %c0_8 = arith.constant 0 : index
    %13 = vector.load %arg2[%c0_7, %c0_8] : memref<32x128xf32, #tpu.memory_space<vmem>>, vector<32x128xf32>
    %cst_9 = arith.constant 0.000000e+00 : f32
    %14 = vector.broadcast %cst_9 : f32 to vector<8x32xf32>
    %c0_10 = arith.constant 0 : index
    %c0_11 = arith.constant 0 : index
    %15 = vector.load %arg12[%c0_10, %c0_11] : memref<8x32xf32, #tpu.memory_space<vmem>>, vector<8x32xf32>
    tpu.vector_store %arg12[%c0_10, %c0_11], %14 {strides = array<i32>} : memref<8x32xf32, #tpu.memory_space<vmem>>, vector<8x32xf32>,
    %cst_12 = arith.constant 0.000000e+00 : f32
    %16 = vector.broadcast %cst_12 : f32 to vector<8x32xf32>
    %c0_13 = arith.constant 0 : index
    %c0_14 = arith.constant 0 : index
    %17 = vector.load %arg13[%c0_13, %c0_14] : memref<8x32xf32, #tpu.memory_space<vmem>>, vector<8x32xf32>
    tpu.vector_store %arg13[%c0_13, %c0_14], %16 {strides = array<i32>} : memref<8x32xf32, #tpu.memory_space<vmem>>, vector<8x32xf32>,
    %c0_i32 = arith.constant 0 : i32
    %c8_i32 = arith.constant 8 : i32
    %18 = arith.muli %c0_i32, %c8_i32 : i32
    %19 = tpu.assume_multiple %18, 8 : i32
    %c0_15 = arith.constant 0 : index
    %c0_16 = arith.constant 0 : index
    %20 = vector.load %arg12[%c0_15, %c0_16] : memref<8x32xf32, #tpu.memory_space<vmem>>, vector<8x32xf32>
    %cst_17 = arith.constant dense<0.000000e+00> : vector<8x128xf32>
    %21 = tpu.matmul %20, %13, %cst_17 {dimension_numbers = #tpu.dot_dimension_numbers<[1], [0], [0], [1], [0, 0, 1, 1], [], []>} : vector<8x32xf32>, vector<32x128xf32>, vector<8x128xf32> -> vector<8x128xf32>
    %22 = arith.index_cast %19 : i32 to index
    %c0_18 = arith.constant 0 : index
    %23 = vector.load %arg10[%22, %c0_18] : memref<64x128xf32, #tpu.memory_space<vmem>>, vector<8x128xf32>
    %24 = arith.addf %21, %23 : vector<8x128xf32>
    %cst_19 = arith.constant 5.000000e-01 : f32
    %25 = vector.broadcast %cst_19 : f32 to vector<8x128xf32>
    %26 = arith.mulf %25, %24 : vector<8x128xf32>
    %27 = arith.select %5, %24, %26 : vector<8x128xi1>, vector<8x128xf32>
    %28 = math.tanh %27 : vector<8x128xf32>
    %cst_20 = arith.constant 1.000000e+00 : f32
    %29 = vector.broadcast %cst_20 : f32 to vector<8x128xf32>
    %30 = arith.addf %28, %29 : vector<8x128xf32>
    %cst_21 = arith.constant 5.000000e-01 : f32
    %31 = vector.broadcast %cst_21 : f32 to vector<8x128xf32>
    %32 = arith.mulf %31, %30 : vector<8x128xf32>
    %33 = arith.select %5, %28, %32 : vector<8x128xi1>, vector<8x128xf32>
    %34 = vector.extract_strided_slice %33 {offsets = [0, 0], sizes = [8, 32], strides = [1, 1]} : vector<8x128xf32> to vector<8x32xf32>
    %35 = vector.extract_strided_slice %33 {offsets = [0, 32], sizes = [8, 32], strides = [1, 1]} : vector<8x128xf32> to vector<8x32xf32>
    %36 = vector.extract_strided_slice %33 {offsets = [0, 64], sizes = [8, 32], strides = [1, 1]} : vector<8x128xf32> to vector<8x32xf32>
    %37 = vector.extract_strided_slice %33 {offsets = [0, 96], sizes = [8, 32], strides = [1, 1]} : vector<8x128xf32> to vector<8x32xf32>
    %c0_22 = arith.constant 0 : index
    %c0_23 = arith.constant 0 : index
    %38 = vector.load %arg13[%c0_22, %c0_23] : memref<8x32xf32, #tpu.memory_space<vmem>>, vector<8x32xf32>
    %39 = arith.mulf %35, %38 : vector<8x32xf32>
    %40 = arith.mulf %34, %36 : vector<8x32xf32>
    %41 = arith.addf %39, %40 : vector<8x32xf32>
    %42 = math.tanh %41 : vector<8x32xf32>
    %43 = arith.mulf %37, %42 : vector<8x32xf32>
    %c0_24 = arith.constant 0 : index
    %c0_25 = arith.constant 0 : index
    %44 = vector.load %arg13[%c0_24, %c0_25] : memref<8x32xf32, #tpu.memory_space<vmem>>, vector<8x32xf32>
    tpu.vector_store %arg13[%c0_24, %c0_25], %41 {strides = array<i32>} : memref<8x32xf32, #tpu.memory_space<vmem>>, vector<8x32xf32>,
    %c0_26 = arith.constant 0 : index
    %c0_27 = arith.constant 0 : index
    %45 = vector.load %arg12[%c0_26, %c0_27] : memref<8x32xf32, #tpu.memory_space<vmem>>, vector<8x32xf32>
    tpu.vector_store %arg12[%c0_26, %c0_27], %43 {strides = array<i32>} : memref<8x32xf32, #tpu.memory_space<vmem>>, vector<8x32xf32>,
    %46 = arith.index_cast %19 : i32 to index
    %c0_28 = arith.constant 0 : index
    %47 = vector.load %arg11[%46, %c0_28] : memref<64x32xf32, #tpu.memory_space<vmem>>, vector<8x32xf32>
    tpu.vector_store %arg11[%46, %c0_28], %43 {strides = array<i32>} : memref<64x32xf32, #tpu.memory_space<vmem>>, vector<8x32xf32>,
    %c1_i32 = arith.constant 1 : i32
    %c8_i32_29 = arith.constant 8 : i32
    %48 = arith.muli %c1_i32, %c8_i32_29 : i32
    %49 = tpu.assume_multiple %48, 8 : i32
    %c0_30 = arith.constant 0 : index
    %c0_31 = arith.constant 0 : index
    %50 = vector.load %arg12[%c0_30, %c0_31] : memref<8x32xf32, #tpu.memory_space<vmem>>, vector<8x32xf32>
    %cst_32 = arith.constant dense<0.000000e+00> : vector<8x128xf32>
    %51 = tpu.matmul %50, %13, %cst_32 {dimension_numbers = #tpu.dot_dimension_numbers<[1], [0], [0], [1], [0, 0, 1, 1], [], []>} : vector<8x32xf32>, vector<32x128xf32>, vector<8x128xf32> -> vector<8x128xf32>
    %52 = arith.index_cast %49 : i32 to index
    %c0_33 = arith.constant 0 : index
    %53 = vector.load %arg10[%52, %c0_33] : memref<64x128xf32, #tpu.memory_space<vmem>>, vector<8x128xf32>
    %54 = arith.addf %51, %53 : vector<8x128xf32>
    %cst_34 = arith.constant 5.000000e-01 : f32
    %55 = vector.broadcast %cst_34 : f32 to vector<8x128xf32>
    %56 = arith.mulf %55, %54 : vector<8x128xf32>
    %57 = arith.select %5, %54, %56 : vector<8x128xi1>, vector<8x128xf32>
    %58 = math.tanh %57 : vector<8x128xf32>
    %cst_35 = arith.constant 1.000000e+00 : f32
    %59 = vector.broadcast %cst_35 : f32 to vector<8x128xf32>
    %60 = arith.addf %58, %59 : vector<8x128xf32>
    %cst_36 = arith.constant 5.000000e-01 : f32
    %61 = vector.broadcast %cst_36 : f32 to vector<8x128xf32>
    %62 = arith.mulf %61, %60 : vector<8x128xf32>
    %63 = arith.select %5, %58, %62 : vector<8x128xi1>, vector<8x128xf32>
    %64 = vector.extract_strided_slice %63 {offsets = [0, 0], sizes = [8, 32], strides = [1, 1]} : vector<8x128xf32> to vector<8x32xf32>
    %65 = vector.extract_strided_slice %63 {offsets = [0, 32], sizes = [8, 32], strides = [1, 1]} : vector<8x128xf32> to vector<8x32xf32>
    %66 = vector.extract_strided_slice %63 {offsets = [0, 64], sizes = [8, 32], strides = [1, 1]} : vector<8x128xf32> to vector<8x32xf32>
    %67 = vector.extract_strided_slice %63 {offsets = [0, 96], sizes = [8, 32], strides = [1, 1]} : vector<8x128xf32> to vector<8x32xf32>
    %c0_37 = arith.constant 0 : index
    %c0_38 = arith.constant 0 : index
    %68 = vector.load %arg13[%c0_37, %c0_38] : memref<8x32xf32, #tpu.memory_space<vmem>>, vector<8x32xf32>
    %69 = arith.mulf %65, %68 : vector<8x32xf32>
    %70 = arith.mulf %64, %66 : vector<8x32xf32>
    %71 = arith.addf %69, %70 : vector<8x32xf32>
    %72 = math.tanh %71 : vector<8x32xf32>
    %73 = arith.mulf %67, %72 : vector<8x32xf32>
    %c0_39 = arith.constant 0 : index
    %c0_40 = arith.constant 0 : index
    %74 = vector.load %arg13[%c0_39, %c0_40] : memref<8x32xf32, #tpu.memory_space<vmem>>, vector<8x32xf32>
    tpu.vector_store %arg13[%c0_39, %c0_40], %71 {strides = array<i32>} : memref<8x32xf32, #tpu.memory_space<vmem>>, vector<8x32xf32>,
    %c0_41 = arith.constant 0 : index
    %c0_42 = arith.constant 0 : index
    %75 = vector.load %arg12[%c0_41, %c0_42] : memref<8x32xf32, #tpu.memory_space<vmem>>, vector<8x32xf32>
    tpu.vector_store %arg12[%c0_41, %c0_42], %73 {strides = array<i32>} : memref<8x32xf32, #tpu.memory_space<vmem>>, vector<8x32xf32>,
    %76 = arith.index_cast %49 : i32 to index
    %c0_43 = arith.constant 0 : index
    %77 = vector.load %arg11[%76, %c0_43] : memref<64x32xf32, #tpu.memory_space<vmem>>, vector<8x32xf32>
    tpu.vector_store %arg11[%76, %c0_43], %73 {strides = array<i32>} : memref<64x32xf32, #tpu.memory_space<vmem>>, vector<8x32xf32>,
    %c2_i32 = arith.constant 2 : i32
    %c8_i32_44 = arith.constant 8 : i32
    %78 = arith.muli %c2_i32, %c8_i32_44 : i32
    %79 = tpu.assume_multiple %78, 8 : i32
    %c0_45 = arith.constant 0 : index
    %c0_46 = arith.constant 0 : index
    %80 = vector.load %arg12[%c0_45, %c0_46] : memref<8x32xf32, #tpu.memory_space<vmem>>, vector<8x32xf32>
    %cst_47 = arith.constant dense<0.000000e+00> : vector<8x128xf32>
    %81 = tpu.matmul %80, %13, %cst_47 {dimension_numbers = #tpu.dot_dimension_numbers<[1], [0], [0], [1], [0, 0, 1, 1], [], []>} : vector<8x32xf32>, vector<32x128xf32>, vector<8x128xf32> -> vector<8x128xf32>
    %82 = arith.index_cast %79 : i32 to index
    %c0_48 = arith.constant 0 : index
    %83 = vector.load %arg10[%82, %c0_48] : memref<64x128xf32, #tpu.memory_space<vmem>>, vector<8x128xf32>
    %84 = arith.addf %81, %83 : vector<8x128xf32>
    %cst_49 = arith.constant 5.000000e-01 : f32
    %85 = vector.broadcast %cst_49 : f32 to vector<8x128xf32>
    %86 = arith.mulf %85, %84 : vector<8x128xf32>
    %87 = arith.select %5, %84, %86 : vector<8x128xi1>, vector<8x128xf32>
    %88 = math.tanh %87 : vector<8x128xf32>
    %cst_50 = arith.constant 1.000000e+00 : f32
    %89 = vector.broadcast %cst_50 : f32 to vector<8x128xf32>
    %90 = arith.addf %88, %89 : vector<8x128xf32>
    %cst_51 = arith.constant 5.000000e-01 : f32
    %91 = vector.broadcast %cst_51 : f32 to vector<8x128xf32>
    %92 = arith.mulf %91, %90 : vector<8x128xf32>
    %93 = arith.select %5, %88, %92 : vector<8x128xi1>, vector<8x128xf32>
    %94 = vector.extract_strided_slice %93 {offsets = [0, 0], sizes = [8, 32], strides = [1, 1]} : vector<8x128xf32> to vector<8x32xf32>
    %95 = vector.extract_strided_slice %93 {offsets = [0, 32], sizes = [8, 32], strides = [1, 1]} : vector<8x128xf32> to vector<8x32xf32>
    %96 = vector.extract_strided_slice %93 {offsets = [0, 64], sizes = [8, 32], strides = [1, 1]} : vector<8x128xf32> to vector<8x32xf32>
    %97 = vector.extract_strided_slice %93 {offsets = [0, 96], sizes = [8, 32], strides = [1, 1]} : vector<8x128xf32> to vector<8x32xf32>
    %c0_52 = arith.constant 0 : index
    %c0_53 = arith.constant 0 : index
    %98 = vector.load %arg13[%c0_52, %c0_53] : memref<8x32xf32, #tpu.memory_space<vmem>>, vector<8x32xf32>
    %99 = arith.mulf %95, %98 : vector<8x32xf32>
    %100 = arith.mulf %94, %96 : vector<8x32xf32>
    %101 = arith.addf %99, %100 : vector<8x32xf32>
    %102 = math.tanh %101 : vector<8x32xf32>
    %103 = arith.mulf %97, %102 : vector<8x32xf32>
    %c0_54 = arith.constant 0 : index
    %c0_55 = arith.constant 0 : index
    %104 = vector.load %arg13[%c0_54, %c0_55] : memref<8x32xf32, #tpu.memory_space<vmem>>, vector<8x32xf32>
    tpu.vector_store %arg13[%c0_54, %c0_55], %101 {strides = array<i32>} : memref<8x32xf32, #tpu.memory_space<vmem>>, vector<8x32xf32>,
    %c0_56 = arith.constant 0 : index
    %c0_57 = arith.constant 0 : index
    %105 = vector.load %arg12[%c0_56, %c0_57] : memref<8x32xf32, #tpu.memory_space<vmem>>, vector<8x32xf32>
    tpu.vector_store %arg12[%c0_56, %c0_57], %103 {strides = array<i32>} : memref<8x32xf32, #tpu.memory_space<vmem>>, vector<8x32xf32>,
    %106 = arith.index_cast %79 : i32 to index
    %c0_58 = arith.constant 0 : index
    %107 = vector.load %arg11[%106, %c0_58] : memref<64x32xf32, #tpu.memory_space<vmem>>, vector<8x32xf32>
    tpu.vector_store %arg11[%106, %c0_58], %103 {strides = array<i32>} : memref<64x32xf32, #tpu.memory_space<vmem>>, vector<8x32xf32>,
    %c3_i32 = arith.constant 3 : i32
    %c8_i32_59 = arith.constant 8 : i32
    %108 = arith.muli %c3_i32, %c8_i32_59 : i32
    %109 = tpu.assume_multiple %108, 8 : i32
    %c0_60 = arith.constant 0 : index
    %c0_61 = arith.constant 0 : index
    %110 = vector.load %arg12[%c0_60, %c0_61] : memref<8x32xf32, #tpu.memory_space<vmem>>, vector<8x32xf32>
    %cst_62 = arith.constant dense<0.000000e+00> : vector<8x128xf32>
    %111 = tpu.matmul %110, %13, %cst_62 {dimension_numbers = #tpu.dot_dimension_numbers<[1], [0], [0], [1], [0, 0, 1, 1], [], []>} : vector<8x32xf32>, vector<32x128xf32>, vector<8x128xf32> -> vector<8x128xf32>
    %112 = arith.index_cast %109 : i32 to index
    %c0_63 = arith.constant 0 : index
    %113 = vector.load %arg10[%112, %c0_63] : memref<64x128xf32, #tpu.memory_space<vmem>>, vector<8x128xf32>
    %114 = arith.addf %111, %113 : vector<8x128xf32>
    %cst_64 = arith.constant 5.000000e-01 : f32
    %115 = vector.broadcast %cst_64 : f32 to vector<8x128xf32>
    %116 = arith.mulf %115, %114 : vector<8x128xf32>
    %117 = arith.select %5, %114, %116 : vector<8x128xi1>, vector<8x128xf32>
    %118 = math.tanh %117 : vector<8x128xf32>
    %cst_65 = arith.constant 1.000000e+00 : f32
    %119 = vector.broadcast %cst_65 : f32 to vector<8x128xf32>
    %120 = arith.addf %118, %119 : vector<8x128xf32>
    %cst_66 = arith.constant 5.000000e-01 : f32
    %121 = vector.broadcast %cst_66 : f32 to vector<8x128xf32>
    %122 = arith.mulf %121, %120 : vector<8x128xf32>
    %123 = arith.select %5, %118, %122 : vector<8x128xi1>, vector<8x128xf32>
    %124 = vector.extract_strided_slice %123 {offsets = [0, 0], sizes = [8, 32], strides = [1, 1]} : vector<8x128xf32> to vector<8x32xf32>
    %125 = vector.extract_strided_slice %123 {offsets = [0, 32], sizes = [8, 32], strides = [1, 1]} : vector<8x128xf32> to vector<8x32xf32>
    %126 = vector.extract_strided_slice %123 {offsets = [0, 64], sizes = [8, 32], strides = [1, 1]} : vector<8x128xf32> to vector<8x32xf32>
    %127 = vector.extract_strided_slice %123 {offsets = [0, 96], sizes = [8, 32], strides = [1, 1]} : vector<8x128xf32> to vector<8x32xf32>
    %c0_67 = arith.constant 0 : index
    %c0_68 = arith.constant 0 : index
    %128 = vector.load %arg13[%c0_67, %c0_68] : memref<8x32xf32, #tpu.memory_space<vmem>>, vector<8x32xf32>
    %129 = arith.mulf %125, %128 : vector<8x32xf32>
    %130 = arith.mulf %124, %126 : vector<8x32xf32>
    %131 = arith.addf %129, %130 : vector<8x32xf32>
    %132 = math.tanh %131 : vector<8x32xf32>
    %133 = arith.mulf %127, %132 : vector<8x32xf32>
    %c0_69 = arith.constant 0 : index
    %c0_70 = arith.constant 0 : index
    %134 = vector.load %arg13[%c0_69, %c0_70] : memref<8x32xf32, #tpu.memory_space<vmem>>, vector<8x32xf32>
    tpu.vector_store %arg13[%c0_69, %c0_70], %131 {strides = array<i32>} : memref<8x32xf32, #tpu.memory_space<vmem>>, vector<8x32xf32>,
    %c0_71 = arith.constant 0 : index
    %c0_72 = arith.constant 0 : index
    %135 = vector.load %arg12[%c0_71, %c0_72] : memref<8x32xf32, #tpu.memory_space<vmem>>, vector<8x32xf32>
    tpu.vector_store %arg12[%c0_71, %c0_72], %133 {strides = array<i32>} : memref<8x32xf32, #tpu.memory_space<vmem>>, vector<8x32xf32>,
    %136 = arith.index_cast %109 : i32 to index
    %c0_73 = arith.constant 0 : index
    %137 = vector.load %arg11[%136, %c0_73] : memref<64x32xf32, #tpu.memory_space<vmem>>, vector<8x32xf32>
    tpu.vector_store %arg11[%136, %c0_73], %133 {strides = array<i32>} : memref<64x32xf32, #tpu.memory_space<vmem>>, vector<8x32xf32>,
    %c4_i32 = arith.constant 4 : i32
    %c8_i32_74 = arith.constant 8 : i32
    %138 = arith.muli %c4_i32, %c8_i32_74 : i32
    %139 = tpu.assume_multiple %138, 8 : i32
    %c0_75 = arith.constant 0 : index
    %c0_76 = arith.constant 0 : index
    %140 = vector.load %arg12[%c0_75, %c0_76] : memref<8x32xf32, #tpu.memory_space<vmem>>, vector<8x32xf32>
    %cst_77 = arith.constant dense<0.000000e+00> : vector<8x128xf32>
    %141 = tpu.matmul %140, %13, %cst_77 {dimension_numbers = #tpu.dot_dimension_numbers<[1], [0], [0], [1], [0, 0, 1, 1], [], []>} : vector<8x32xf32>, vector<32x128xf32>, vector<8x128xf32> -> vector<8x128xf32>
    %142 = arith.index_cast %139 : i32 to index
    %c0_78 = arith.constant 0 : index
    %143 = vector.load %arg10[%142, %c0_78] : memref<64x128xf32, #tpu.memory_space<vmem>>, vector<8x128xf32>
    %144 = arith.addf %141, %143 : vector<8x128xf32>
    %cst_79 = arith.constant 5.000000e-01 : f32
    %145 = vector.broadcast %cst_79 : f32 to vector<8x128xf32>
    %146 = arith.mulf %145, %144 : vector<8x128xf32>
    %147 = arith.select %5, %144, %146 : vector<8x128xi1>, vector<8x128xf32>
    %148 = math.tanh %147 : vector<8x128xf32>
    %cst_80 = arith.constant 1.000000e+00 : f32
    %149 = vector.broadcast %cst_80 : f32 to vector<8x128xf32>
    %150 = arith.addf %148, %149 : vector<8x128xf32>
    %cst_81 = arith.constant 5.000000e-01 : f32
    %151 = vector.broadcast %cst_81 : f32 to vector<8x128xf32>
    %152 = arith.mulf %151, %150 : vector<8x128xf32>
    %153 = arith.select %5, %148, %152 : vector<8x128xi1>, vector<8x128xf32>
    %154 = vector.extract_strided_slice %153 {offsets = [0, 0], sizes = [8, 32], strides = [1, 1]} : vector<8x128xf32> to vector<8x32xf32>
    %155 = vector.extract_strided_slice %153 {offsets = [0, 32], sizes = [8, 32], strides = [1, 1]} : vector<8x128xf32> to vector<8x32xf32>
    %156 = vector.extract_strided_slice %153 {offsets = [0, 64], sizes = [8, 32], strides = [1, 1]} : vector<8x128xf32> to vector<8x32xf32>
    %157 = vector.extract_strided_slice %153 {offsets = [0, 96], sizes = [8, 32], strides = [1, 1]} : vector<8x128xf32> to vector<8x32xf32>
    %c0_82 = arith.constant 0 : index
    %c0_83 = arith.constant 0 : index
    %158 = vector.load %arg13[%c0_82, %c0_83] : memref<8x32xf32, #tpu.memory_space<vmem>>, vector<8x32xf32>
    %159 = arith.mulf %155, %158 : vector<8x32xf32>
    %160 = arith.mulf %154, %156 : vector<8x32xf32>
    %161 = arith.addf %159, %160 : vector<8x32xf32>
    %162 = math.tanh %161 : vector<8x32xf32>
    %163 = arith.mulf %157, %162 : vector<8x32xf32>
    %c0_84 = arith.constant 0 : index
    %c0_85 = arith.constant 0 : index
    %164 = vector.load %arg13[%c0_84, %c0_85] : memref<8x32xf32, #tpu.memory_space<vmem>>, vector<8x32xf32>
    tpu.vector_store %arg13[%c0_84, %c0_85], %161 {strides = array<i32>} : memref<8x32xf32, #tpu.memory_space<vmem>>, vector<8x32xf32>,
    %c0_86 = arith.constant 0 : index
    %c0_87 = arith.constant 0 : index
    %165 = vector.load %arg12[%c0_86, %c0_87] : memref<8x32xf32, #tpu.memory_space<vmem>>, vector<8x32xf32>
    tpu.vector_store %arg12[%c0_86, %c0_87], %163 {strides = array<i32>} : memref<8x32xf32, #tpu.memory_space<vmem>>, vector<8x32xf32>,
    %166 = arith.index_cast %139 : i32 to index
    %c0_88 = arith.constant 0 : index
    %167 = vector.load %arg11[%166, %c0_88] : memref<64x32xf32, #tpu.memory_space<vmem>>, vector<8x32xf32>
    tpu.vector_store %arg11[%166, %c0_88], %163 {strides = array<i32>} : memref<64x32xf32, #tpu.memory_space<vmem>>, vector<8x32xf32>,
    %c5_i32 = arith.constant 5 : i32
    %c8_i32_89 = arith.constant 8 : i32
    %168 = arith.muli %c5_i32, %c8_i32_89 : i32
    %169 = tpu.assume_multiple %168, 8 : i32
    %c0_90 = arith.constant 0 : index
    %c0_91 = arith.constant 0 : index
    %170 = vector.load %arg12[%c0_90, %c0_91] : memref<8x32xf32, #tpu.memory_space<vmem>>, vector<8x32xf32>
    %cst_92 = arith.constant dense<0.000000e+00> : vector<8x128xf32>
    %171 = tpu.matmul %170, %13, %cst_92 {dimension_numbers = #tpu.dot_dimension_numbers<[1], [0], [0], [1], [0, 0, 1, 1], [], []>} : vector<8x32xf32>, vector<32x128xf32>, vector<8x128xf32> -> vector<8x128xf32>
    %172 = arith.index_cast %169 : i32 to index
    %c0_93 = arith.constant 0 : index
    %173 = vector.load %arg10[%172, %c0_93] : memref<64x128xf32, #tpu.memory_space<vmem>>, vector<8x128xf32>
    %174 = arith.addf %171, %173 : vector<8x128xf32>
    %cst_94 = arith.constant 5.000000e-01 : f32
    %175 = vector.broadcast %cst_94 : f32 to vector<8x128xf32>
    %176 = arith.mulf %175, %174 : vector<8x128xf32>
    %177 = arith.select %5, %174, %176 : vector<8x128xi1>, vector<8x128xf32>
    %178 = math.tanh %177 : vector<8x128xf32>
    %cst_95 = arith.constant 1.000000e+00 : f32
    %179 = vector.broadcast %cst_95 : f32 to vector<8x128xf32>
    %180 = arith.addf %178, %179 : vector<8x128xf32>
    %cst_96 = arith.constant 5.000000e-01 : f32
    %181 = vector.broadcast %cst_96 : f32 to vector<8x128xf32>
    %182 = arith.mulf %181, %180 : vector<8x128xf32>
    %183 = arith.select %5, %178, %182 : vector<8x128xi1>, vector<8x128xf32>
    %184 = vector.extract_strided_slice %183 {offsets = [0, 0], sizes = [8, 32], strides = [1, 1]} : vector<8x128xf32> to vector<8x32xf32>
    %185 = vector.extract_strided_slice %183 {offsets = [0, 32], sizes = [8, 32], strides = [1, 1]} : vector<8x128xf32> to vector<8x32xf32>
    %186 = vector.extract_strided_slice %183 {offsets = [0, 64], sizes = [8, 32], strides = [1, 1]} : vector<8x128xf32> to vector<8x32xf32>
    %187 = vector.extract_strided_slice %183 {offsets = [0, 96], sizes = [8, 32], strides = [1, 1]} : vector<8x128xf32> to vector<8x32xf32>
    %c0_97 = arith.constant 0 : index
    %c0_98 = arith.constant 0 : index
    %188 = vector.load %arg13[%c0_97, %c0_98] : memref<8x32xf32, #tpu.memory_space<vmem>>, vector<8x32xf32>
    %189 = arith.mulf %185, %188 : vector<8x32xf32>
    %190 = arith.mulf %184, %186 : vector<8x32xf32>
    %191 = arith.addf %189, %190 : vector<8x32xf32>
    %192 = math.tanh %191 : vector<8x32xf32>
    %193 = arith.mulf %187, %192 : vector<8x32xf32>
    %c0_99 = arith.constant 0 : index
    %c0_100 = arith.constant 0 : index
    %194 = vector.load %arg13[%c0_99, %c0_100] : memref<8x32xf32, #tpu.memory_space<vmem>>, vector<8x32xf32>
    tpu.vector_store %arg13[%c0_99, %c0_100], %191 {strides = array<i32>} : memref<8x32xf32, #tpu.memory_space<vmem>>, vector<8x32xf32>,
    %c0_101 = arith.constant 0 : index
    %c0_102 = arith.constant 0 : index
    %195 = vector.load %arg12[%c0_101, %c0_102] : memref<8x32xf32, #tpu.memory_space<vmem>>, vector<8x32xf32>
    tpu.vector_store %arg12[%c0_101, %c0_102], %193 {strides = array<i32>} : memref<8x32xf32, #tpu.memory_space<vmem>>, vector<8x32xf32>,
    %196 = arith.index_cast %169 : i32 to index
    %c0_103 = arith.constant 0 : index
    %197 = vector.load %arg11[%196, %c0_103] : memref<64x32xf32, #tpu.memory_space<vmem>>, vector<8x32xf32>
    tpu.vector_store %arg11[%196, %c0_103], %193 {strides = array<i32>} : memref<64x32xf32, #tpu.memory_space<vmem>>, vector<8x32xf32>,
    %c6_i32 = arith.constant 6 : i32
    %c8_i32_104 = arith.constant 8 : i32
    %198 = arith.muli %c6_i32, %c8_i32_104 : i32
    %199 = tpu.assume_multiple %198, 8 : i32
    %c0_105 = arith.constant 0 : index
    %c0_106 = arith.constant 0 : index
    %200 = vector.load %arg12[%c0_105, %c0_106] : memref<8x32xf32, #tpu.memory_space<vmem>>, vector<8x32xf32>
    %cst_107 = arith.constant dense<0.000000e+00> : vector<8x128xf32>
    %201 = tpu.matmul %200, %13, %cst_107 {dimension_numbers = #tpu.dot_dimension_numbers<[1], [0], [0], [1], [0, 0, 1, 1], [], []>} : vector<8x32xf32>, vector<32x128xf32>, vector<8x128xf32> -> vector<8x128xf32>
    %202 = arith.index_cast %199 : i32 to index
    %c0_108 = arith.constant 0 : index
    %203 = vector.load %arg10[%202, %c0_108] : memref<64x128xf32, #tpu.memory_space<vmem>>, vector<8x128xf32>
    %204 = arith.addf %201, %203 : vector<8x128xf32>
    %cst_109 = arith.constant 5.000000e-01 : f32
    %205 = vector.broadcast %cst_109 : f32 to vector<8x128xf32>
    %206 = arith.mulf %205, %204 : vector<8x128xf32>
    %207 = arith.select %5, %204, %206 : vector<8x128xi1>, vector<8x128xf32>
    %208 = math.tanh %207 : vector<8x128xf32>
    %cst_110 = arith.constant 1.000000e+00 : f32
    %209 = vector.broadcast %cst_110 : f32 to vector<8x128xf32>
    %210 = arith.addf %208, %209 : vector<8x128xf32>
    %cst_111 = arith.constant 5.000000e-01 : f32
    %211 = vector.broadcast %cst_111 : f32 to vector<8x128xf32>
    %212 = arith.mulf %211, %210 : vector<8x128xf32>
    %213 = arith.select %5, %208, %212 : vector<8x128xi1>, vector<8x128xf32>
    %214 = vector.extract_strided_slice %213 {offsets = [0, 0], sizes = [8, 32], strides = [1, 1]} : vector<8x128xf32> to vector<8x32xf32>
    %215 = vector.extract_strided_slice %213 {offsets = [0, 32], sizes = [8, 32], strides = [1, 1]} : vector<8x128xf32> to vector<8x32xf32>
    %216 = vector.extract_strided_slice %213 {offsets = [0, 64], sizes = [8, 32], strides = [1, 1]} : vector<8x128xf32> to vector<8x32xf32>
    %217 = vector.extract_strided_slice %213 {offsets = [0, 96], sizes = [8, 32], strides = [1, 1]} : vector<8x128xf32> to vector<8x32xf32>
    %c0_112 = arith.constant 0 : index
    %c0_113 = arith.constant 0 : index
    %218 = vector.load %arg13[%c0_112, %c0_113] : memref<8x32xf32, #tpu.memory_space<vmem>>, vector<8x32xf32>
    %219 = arith.mulf %215, %218 : vector<8x32xf32>
    %220 = arith.mulf %214, %216 : vector<8x32xf32>
    %221 = arith.addf %219, %220 : vector<8x32xf32>
    %222 = math.tanh %221 : vector<8x32xf32>
    %223 = arith.mulf %217, %222 : vector<8x32xf32>
    %c0_114 = arith.constant 0 : index
    %c0_115 = arith.constant 0 : index
    %224 = vector.load %arg13[%c0_114, %c0_115] : memref<8x32xf32, #tpu.memory_space<vmem>>, vector<8x32xf32>
    tpu.vector_store %arg13[%c0_114, %c0_115], %221 {strides = array<i32>} : memref<8x32xf32, #tpu.memory_space<vmem>>, vector<8x32xf32>,
    %c0_116 = arith.constant 0 : index
    %c0_117 = arith.constant 0 : index
    %225 = vector.load %arg12[%c0_116, %c0_117] : memref<8x32xf32, #tpu.memory_space<vmem>>, vector<8x32xf32>
    tpu.vector_store %arg12[%c0_116, %c0_117], %223 {strides = array<i32>} : memref<8x32xf32, #tpu.memory_space<vmem>>, vector<8x32xf32>,
    %226 = arith.index_cast %199 : i32 to index
    %c0_118 = arith.constant 0 : index
    %227 = vector.load %arg11[%226, %c0_118] : memref<64x32xf32, #tpu.memory_space<vmem>>, vector<8x32xf32>
    tpu.vector_store %arg11[%226, %c0_118], %223 {strides = array<i32>} : memref<64x32xf32, #tpu.memory_space<vmem>>, vector<8x32xf32>,
    %c7_i32 = arith.constant 7 : i32
    %c8_i32_119 = arith.constant 8 : i32
    %228 = arith.muli %c7_i32, %c8_i32_119 : i32
    %229 = tpu.assume_multiple %228, 8 : i32
    %c0_120 = arith.constant 0 : index
    %c0_121 = arith.constant 0 : index
    %230 = vector.load %arg12[%c0_120, %c0_121] : memref<8x32xf32, #tpu.memory_space<vmem>>, vector<8x32xf32>
    %cst_122 = arith.constant dense<0.000000e+00> : vector<8x128xf32>
    %231 = tpu.matmul %230, %13, %cst_122 {dimension_numbers = #tpu.dot_dimension_numbers<[1], [0], [0], [1], [0, 0, 1, 1], [], []>} : vector<8x32xf32>, vector<32x128xf32>, vector<8x128xf32> -> vector<8x128xf32>
    %232 = arith.index_cast %229 : i32 to index
    %c0_123 = arith.constant 0 : index
    %233 = vector.load %arg10[%232, %c0_123] : memref<64x128xf32, #tpu.memory_space<vmem>>, vector<8x128xf32>
    %234 = arith.addf %231, %233 : vector<8x128xf32>
    %cst_124 = arith.constant 5.000000e-01 : f32
    %235 = vector.broadcast %cst_124 : f32 to vector<8x128xf32>
    %236 = arith.mulf %235, %234 : vector<8x128xf32>
    %237 = arith.select %5, %234, %236 : vector<8x128xi1>, vector<8x128xf32>
    %238 = math.tanh %237 : vector<8x128xf32>
    %cst_125 = arith.constant 1.000000e+00 : f32
    %239 = vector.broadcast %cst_125 : f32 to vector<8x128xf32>
    %240 = arith.addf %238, %239 : vector<8x128xf32>
    %cst_126 = arith.constant 5.000000e-01 : f32
    %241 = vector.broadcast %cst_126 : f32 to vector<8x128xf32>
    %242 = arith.mulf %241, %240 : vector<8x128xf32>
    %243 = arith.select %5, %238, %242 : vector<8x128xi1>, vector<8x128xf32>
    %244 = vector.extract_strided_slice %243 {offsets = [0, 0], sizes = [8, 32], strides = [1, 1]} : vector<8x128xf32> to vector<8x32xf32>
    %245 = vector.extract_strided_slice %243 {offsets = [0, 32], sizes = [8, 32], strides = [1, 1]} : vector<8x128xf32> to vector<8x32xf32>
    %246 = vector.extract_strided_slice %243 {offsets = [0, 64], sizes = [8, 32], strides = [1, 1]} : vector<8x128xf32> to vector<8x32xf32>
    %247 = vector.extract_strided_slice %243 {offsets = [0, 96], sizes = [8, 32], strides = [1, 1]} : vector<8x128xf32> to vector<8x32xf32>
    %c0_127 = arith.constant 0 : index
    %c0_128 = arith.constant 0 : index
    %248 = vector.load %arg13[%c0_127, %c0_128] : memref<8x32xf32, #tpu.memory_space<vmem>>, vector<8x32xf32>
    %249 = arith.mulf %245, %248 : vector<8x32xf32>
    %250 = arith.mulf %244, %246 : vector<8x32xf32>
    %251 = arith.addf %249, %250 : vector<8x32xf32>
    %252 = math.tanh %251 : vector<8x32xf32>
    %253 = arith.mulf %247, %252 : vector<8x32xf32>
    %c0_129 = arith.constant 0 : index
    %c0_130 = arith.constant 0 : index
    %254 = vector.load %arg13[%c0_129, %c0_130] : memref<8x32xf32, #tpu.memory_space<vmem>>, vector<8x32xf32>
    tpu.vector_store %arg13[%c0_129, %c0_130], %251 {strides = array<i32>} : memref<8x32xf32, #tpu.memory_space<vmem>>, vector<8x32xf32>,
    %c0_131 = arith.constant 0 : index
    %c0_132 = arith.constant 0 : index
    %255 = vector.load %arg12[%c0_131, %c0_132] : memref<8x32xf32, #tpu.memory_space<vmem>>, vector<8x32xf32>
    tpu.vector_store %arg12[%c0_131, %c0_132], %253 {strides = array<i32>} : memref<8x32xf32, #tpu.memory_space<vmem>>, vector<8x32xf32>,
    %256 = arith.index_cast %229 : i32 to index
    %c0_133 = arith.constant 0 : index
    %257 = vector.load %arg11[%256, %c0_133] : memref<64x32xf32, #tpu.memory_space<vmem>>, vector<8x32xf32>
    tpu.vector_store %arg11[%256, %c0_133], %253 {strides = array<i32>} : memref<64x32xf32, #tpu.memory_space<vmem>>, vector<8x32xf32>,
    %c8_i32_134 = arith.constant 8 : i32
    %c0_135 = arith.constant 0 : index
    %c0_136 = arith.constant 0 : index
    %258 = vector.load %arg11[%c0_135, %c0_136] : memref<64x32xf32, #tpu.memory_space<vmem>>, vector<64x32xf32>
    %c0_137 = arith.constant 0 : index
    %c0_138 = arith.constant 0 : index
    %259 = vector.load %arg4[%c0_137, %c0_138] : memref<32x128xf32, #tpu.memory_space<vmem>>, vector<32x128xf32>
    %cst_139 = arith.constant dense<0.000000e+00> : vector<64x128xf32>
    %260 = tpu.matmul %258, %259, %cst_139 {dimension_numbers = #tpu.dot_dimension_numbers<[1], [0], [0], [1], [0, 0, 1, 1], [], []>} : vector<64x32xf32>, vector<32x128xf32>, vector<64x128xf32> -> vector<64x128xf32>
    %c0_140 = arith.constant 0 : index
    %c0_141 = arith.constant 0 : index
    %261 = vector.load %arg6[%c0_140, %c0_141] : memref<1x128xf32, #tpu.memory_space<vmem>>, vector<1x128xf32>
    %262 = vector.broadcast %261 : vector<1x128xf32> to vector<64x128xf32>
    %263 = arith.addf %260, %262 : vector<64x128xf32>
    %c0_142 = arith.constant 0 : index
    %c0_143 = arith.constant 0 : index
    %264 = vector.load %arg10[%c0_142, %c0_143] : memref<64x128xf32, #tpu.memory_space<vmem>>, vector<64x128xf32>
    tpu.vector_store %arg10[%c0_142, %c0_143], %263 {strides = array<i32>} : memref<64x128xf32, #tpu.memory_space<vmem>>, vector<64x128xf32>,
    %c0_144 = arith.constant 0 : index
    %c0_145 = arith.constant 0 : index
    %265 = vector.load %arg5[%c0_144, %c0_145] : memref<32x128xf32, #tpu.memory_space<vmem>>, vector<32x128xf32>
    %cst_146 = arith.constant 0.000000e+00 : f32
    %266 = vector.broadcast %cst_146 : f32 to vector<8x32xf32>
    %c0_147 = arith.constant 0 : index
    %c0_148 = arith.constant 0 : index
    %267 = vector.load %arg12[%c0_147, %c0_148] : memref<8x32xf32, #tpu.memory_space<vmem>>, vector<8x32xf32>
    tpu.vector_store %arg12[%c0_147, %c0_148], %266 {strides = array<i32>} : memref<8x32xf32, #tpu.memory_space<vmem>>, vector<8x32xf32>,
    %cst_149 = arith.constant 0.000000e+00 : f32
    %268 = vector.broadcast %cst_149 : f32 to vector<8x32xf32>
    %c0_150 = arith.constant 0 : index
    %c0_151 = arith.constant 0 : index
    %269 = vector.load %arg13[%c0_150, %c0_151] : memref<8x32xf32, #tpu.memory_space<vmem>>, vector<8x32xf32>
    tpu.vector_store %arg13[%c0_150, %c0_151], %268 {strides = array<i32>} : memref<8x32xf32, #tpu.memory_space<vmem>>, vector<8x32xf32>,
    %c0_i32_152 = arith.constant 0 : i32
    %c8_i32_153 = arith.constant 8 : i32
    %270 = arith.muli %c0_i32_152, %c8_i32_153 : i32
    %271 = tpu.assume_multiple %270, 8 : i32
    %c0_154 = arith.constant 0 : index
    %c0_155 = arith.constant 0 : index
    %272 = vector.load %arg12[%c0_154, %c0_155] : memref<8x32xf32, #tpu.memory_space<vmem>>, vector<8x32xf32>
    %cst_156 = arith.constant dense<0.000000e+00> : vector<8x128xf32>
    %273 = tpu.matmul %272, %265, %cst_156 {dimension_numbers = #tpu.dot_dimension_numbers<[1], [0], [0], [1], [0, 0, 1, 1], [], []>} : vector<8x32xf32>, vector<32x128xf32>, vector<8x128xf32> -> vector<8x128xf32>
    %274 = arith.index_cast %271 : i32 to index
    %c0_157 = arith.constant 0 : index
    %275 = vector.load %arg10[%274, %c0_157] : memref<64x128xf32, #tpu.memory_space<vmem>>, vector<8x128xf32>
    %276 = arith.addf %273, %275 : vector<8x128xf32>
    %cst_158 = arith.constant 5.000000e-01 : f32
    %277 = vector.broadcast %cst_158 : f32 to vector<8x128xf32>
    %278 = arith.mulf %277, %276 : vector<8x128xf32>
    %279 = arith.select %5, %276, %278 : vector<8x128xi1>, vector<8x128xf32>
    %280 = math.tanh %279 : vector<8x128xf32>
    %cst_159 = arith.constant 1.000000e+00 : f32
    %281 = vector.broadcast %cst_159 : f32 to vector<8x128xf32>
    %282 = arith.addf %280, %281 : vector<8x128xf32>
    %cst_160 = arith.constant 5.000000e-01 : f32
    %283 = vector.broadcast %cst_160 : f32 to vector<8x128xf32>
    %284 = arith.mulf %283, %282 : vector<8x128xf32>
    %285 = arith.select %5, %280, %284 : vector<8x128xi1>, vector<8x128xf32>
    %286 = vector.extract_strided_slice %285 {offsets = [0, 0], sizes = [8, 32], strides = [1, 1]} : vector<8x128xf32> to vector<8x32xf32>
    %287 = vector.extract_strided_slice %285 {offsets = [0, 32], sizes = [8, 32], strides = [1, 1]} : vector<8x128xf32> to vector<8x32xf32>
    %288 = vector.extract_strided_slice %285 {offsets = [0, 64], sizes = [8, 32], strides = [1, 1]} : vector<8x128xf32> to vector<8x32xf32>
    %289 = vector.extract_strided_slice %285 {offsets = [0, 96], sizes = [8, 32], strides = [1, 1]} : vector<8x128xf32> to vector<8x32xf32>
    %c0_161 = arith.constant 0 : index
    %c0_162 = arith.constant 0 : index
    %290 = vector.load %arg13[%c0_161, %c0_162] : memref<8x32xf32, #tpu.memory_space<vmem>>, vector<8x32xf32>
    %291 = arith.mulf %287, %290 : vector<8x32xf32>
    %292 = arith.mulf %286, %288 : vector<8x32xf32>
    %293 = arith.addf %291, %292 : vector<8x32xf32>
    %294 = math.tanh %293 : vector<8x32xf32>
    %295 = arith.mulf %289, %294 : vector<8x32xf32>
    %c0_163 = arith.constant 0 : index
    %c0_164 = arith.constant 0 : index
    %296 = vector.load %arg13[%c0_163, %c0_164] : memref<8x32xf32, #tpu.memory_space<vmem>>, vector<8x32xf32>
    tpu.vector_store %arg13[%c0_163, %c0_164], %293 {strides = array<i32>} : memref<8x32xf32, #tpu.memory_space<vmem>>, vector<8x32xf32>,
    %c0_165 = arith.constant 0 : index
    %c0_166 = arith.constant 0 : index
    %297 = vector.load %arg12[%c0_165, %c0_166] : memref<8x32xf32, #tpu.memory_space<vmem>>, vector<8x32xf32>
    tpu.vector_store %arg12[%c0_165, %c0_166], %295 {strides = array<i32>} : memref<8x32xf32, #tpu.memory_space<vmem>>, vector<8x32xf32>,
    %c1_i32_167 = arith.constant 1 : i32
    %c8_i32_168 = arith.constant 8 : i32
    %298 = arith.muli %c1_i32_167, %c8_i32_168 : i32
    %299 = tpu.assume_multiple %298, 8 : i32
    %c0_169 = arith.constant 0 : index
    %c0_170 = arith.constant 0 : index
    %300 = vector.load %arg12[%c0_169, %c0_170] : memref<8x32xf32, #tpu.memory_space<vmem>>, vector<8x32xf32>
    %cst_171 = arith.constant dense<0.000000e+00> : vector<8x128xf32>
    %301 = tpu.matmul %300, %265, %cst_171 {dimension_numbers = #tpu.dot_dimension_numbers<[1], [0], [0], [1], [0, 0, 1, 1], [], []>} : vector<8x32xf32>, vector<32x128xf32>, vector<8x128xf32> -> vector<8x128xf32>
    %302 = arith.index_cast %299 : i32 to index
    %c0_172 = arith.constant 0 : index
    %303 = vector.load %arg10[%302, %c0_172] : memref<64x128xf32, #tpu.memory_space<vmem>>, vector<8x128xf32>
    %304 = arith.addf %301, %303 : vector<8x128xf32>
    %cst_173 = arith.constant 5.000000e-01 : f32
    %305 = vector.broadcast %cst_173 : f32 to vector<8x128xf32>
    %306 = arith.mulf %305, %304 : vector<8x128xf32>
    %307 = arith.select %5, %304, %306 : vector<8x128xi1>, vector<8x128xf32>
    %308 = math.tanh %307 : vector<8x128xf32>
    %cst_174 = arith.constant 1.000000e+00 : f32
    %309 = vector.broadcast %cst_174 : f32 to vector<8x128xf32>
    %310 = arith.addf %308, %309 : vector<8x128xf32>
    %cst_175 = arith.constant 5.000000e-01 : f32
    %311 = vector.broadcast %cst_175 : f32 to vector<8x128xf32>
    %312 = arith.mulf %311, %310 : vector<8x128xf32>
    %313 = arith.select %5, %308, %312 : vector<8x128xi1>, vector<8x128xf32>
    %314 = vector.extract_strided_slice %313 {offsets = [0, 0], sizes = [8, 32], strides = [1, 1]} : vector<8x128xf32> to vector<8x32xf32>
    %315 = vector.extract_strided_slice %313 {offsets = [0, 32], sizes = [8, 32], strides = [1, 1]} : vector<8x128xf32> to vector<8x32xf32>
    %316 = vector.extract_strided_slice %313 {offsets = [0, 64], sizes = [8, 32], strides = [1, 1]} : vector<8x128xf32> to vector<8x32xf32>
    %317 = vector.extract_strided_slice %313 {offsets = [0, 96], sizes = [8, 32], strides = [1, 1]} : vector<8x128xf32> to vector<8x32xf32>
    %c0_176 = arith.constant 0 : index
    %c0_177 = arith.constant 0 : index
    %318 = vector.load %arg13[%c0_176, %c0_177] : memref<8x32xf32, #tpu.memory_space<vmem>>, vector<8x32xf32>
    %319 = arith.mulf %315, %318 : vector<8x32xf32>
    %320 = arith.mulf %314, %316 : vector<8x32xf32>
    %321 = arith.addf %319, %320 : vector<8x32xf32>
    %322 = math.tanh %321 : vector<8x32xf32>
    %323 = arith.mulf %317, %322 : vector<8x32xf32>
    %c0_178 = arith.constant 0 : index
    %c0_179 = arith.constant 0 : index
    %324 = vector.load %arg13[%c0_178, %c0_179] : memref<8x32xf32, #tpu.memory_space<vmem>>, vector<8x32xf32>
    tpu.vector_store %arg13[%c0_178, %c0_179], %321 {strides = array<i32>} : memref<8x32xf32, #tpu.memory_space<vmem>>, vector<8x32xf32>,
    %c0_180 = arith.constant 0 : index
    %c0_181 = arith.constant 0 : index
    %325 = vector.load %arg12[%c0_180, %c0_181] : memref<8x32xf32, #tpu.memory_space<vmem>>, vector<8x32xf32>
    tpu.vector_store %arg12[%c0_180, %c0_181], %323 {strides = array<i32>} : memref<8x32xf32, #tpu.memory_space<vmem>>, vector<8x32xf32>,
    %c2_i32_182 = arith.constant 2 : i32
    %c8_i32_183 = arith.constant 8 : i32
    %326 = arith.muli %c2_i32_182, %c8_i32_183 : i32
    %327 = tpu.assume_multiple %326, 8 : i32
    %c0_184 = arith.constant 0 : index
    %c0_185 = arith.constant 0 : index
    %328 = vector.load %arg12[%c0_184, %c0_185] : memref<8x32xf32, #tpu.memory_space<vmem>>, vector<8x32xf32>
    %cst_186 = arith.constant dense<0.000000e+00> : vector<8x128xf32>
    %329 = tpu.matmul %328, %265, %cst_186 {dimension_numbers = #tpu.dot_dimension_numbers<[1], [0], [0], [1], [0, 0, 1, 1], [], []>} : vector<8x32xf32>, vector<32x128xf32>, vector<8x128xf32> -> vector<8x128xf32>
    %330 = arith.index_cast %327 : i32 to index
    %c0_187 = arith.constant 0 : index
    %331 = vector.load %arg10[%330, %c0_187] : memref<64x128xf32, #tpu.memory_space<vmem>>, vector<8x128xf32>
    %332 = arith.addf %329, %331 : vector<8x128xf32>
    %cst_188 = arith.constant 5.000000e-01 : f32
    %333 = vector.broadcast %cst_188 : f32 to vector<8x128xf32>
    %334 = arith.mulf %333, %332 : vector<8x128xf32>
    %335 = arith.select %5, %332, %334 : vector<8x128xi1>, vector<8x128xf32>
    %336 = math.tanh %335 : vector<8x128xf32>
    %cst_189 = arith.constant 1.000000e+00 : f32
    %337 = vector.broadcast %cst_189 : f32 to vector<8x128xf32>
    %338 = arith.addf %336, %337 : vector<8x128xf32>
    %cst_190 = arith.constant 5.000000e-01 : f32
    %339 = vector.broadcast %cst_190 : f32 to vector<8x128xf32>
    %340 = arith.mulf %339, %338 : vector<8x128xf32>
    %341 = arith.select %5, %336, %340 : vector<8x128xi1>, vector<8x128xf32>
    %342 = vector.extract_strided_slice %341 {offsets = [0, 0], sizes = [8, 32], strides = [1, 1]} : vector<8x128xf32> to vector<8x32xf32>
    %343 = vector.extract_strided_slice %341 {offsets = [0, 32], sizes = [8, 32], strides = [1, 1]} : vector<8x128xf32> to vector<8x32xf32>
    %344 = vector.extract_strided_slice %341 {offsets = [0, 64], sizes = [8, 32], strides = [1, 1]} : vector<8x128xf32> to vector<8x32xf32>
    %345 = vector.extract_strided_slice %341 {offsets = [0, 96], sizes = [8, 32], strides = [1, 1]} : vector<8x128xf32> to vector<8x32xf32>
    %c0_191 = arith.constant 0 : index
    %c0_192 = arith.constant 0 : index
    %346 = vector.load %arg13[%c0_191, %c0_192] : memref<8x32xf32, #tpu.memory_space<vmem>>, vector<8x32xf32>
    %347 = arith.mulf %343, %346 : vector<8x32xf32>
    %348 = arith.mulf %342, %344 : vector<8x32xf32>
    %349 = arith.addf %347, %348 : vector<8x32xf32>
    %350 = math.tanh %349 : vector<8x32xf32>
    %351 = arith.mulf %345, %350 : vector<8x32xf32>
    %c0_193 = arith.constant 0 : index
    %c0_194 = arith.constant 0 : index
    %352 = vector.load %arg13[%c0_193, %c0_194] : memref<8x32xf32, #tpu.memory_space<vmem>>, vector<8x32xf32>
    tpu.vector_store %arg13[%c0_193, %c0_194], %349 {strides = array<i32>} : memref<8x32xf32, #tpu.memory_space<vmem>>, vector<8x32xf32>,
    %c0_195 = arith.constant 0 : index
    %c0_196 = arith.constant 0 : index
    %353 = vector.load %arg12[%c0_195, %c0_196] : memref<8x32xf32, #tpu.memory_space<vmem>>, vector<8x32xf32>
    tpu.vector_store %arg12[%c0_195, %c0_196], %351 {strides = array<i32>} : memref<8x32xf32, #tpu.memory_space<vmem>>, vector<8x32xf32>,
    %c3_i32_197 = arith.constant 3 : i32
    %c8_i32_198 = arith.constant 8 : i32
    %354 = arith.muli %c3_i32_197, %c8_i32_198 : i32
    %355 = tpu.assume_multiple %354, 8 : i32
    %c0_199 = arith.constant 0 : index
    %c0_200 = arith.constant 0 : index
    %356 = vector.load %arg12[%c0_199, %c0_200] : memref<8x32xf32, #tpu.memory_space<vmem>>, vector<8x32xf32>
    %cst_201 = arith.constant dense<0.000000e+00> : vector<8x128xf32>
    %357 = tpu.matmul %356, %265, %cst_201 {dimension_numbers = #tpu.dot_dimension_numbers<[1], [0], [0], [1], [0, 0, 1, 1], [], []>} : vector<8x32xf32>, vector<32x128xf32>, vector<8x128xf32> -> vector<8x128xf32>
    %358 = arith.index_cast %355 : i32 to index
    %c0_202 = arith.constant 0 : index
    %359 = vector.load %arg10[%358, %c0_202] : memref<64x128xf32, #tpu.memory_space<vmem>>, vector<8x128xf32>
    %360 = arith.addf %357, %359 : vector<8x128xf32>
    %cst_203 = arith.constant 5.000000e-01 : f32
    %361 = vector.broadcast %cst_203 : f32 to vector<8x128xf32>
    %362 = arith.mulf %361, %360 : vector<8x128xf32>
    %363 = arith.select %5, %360, %362 : vector<8x128xi1>, vector<8x128xf32>
    %364 = math.tanh %363 : vector<8x128xf32>
    %cst_204 = arith.constant 1.000000e+00 : f32
    %365 = vector.broadcast %cst_204 : f32 to vector<8x128xf32>
    %366 = arith.addf %364, %365 : vector<8x128xf32>
    %cst_205 = arith.constant 5.000000e-01 : f32
    %367 = vector.broadcast %cst_205 : f32 to vector<8x128xf32>
    %368 = arith.mulf %367, %366 : vector<8x128xf32>
    %369 = arith.select %5, %364, %368 : vector<8x128xi1>, vector<8x128xf32>
    %370 = vector.extract_strided_slice %369 {offsets = [0, 0], sizes = [8, 32], strides = [1, 1]} : vector<8x128xf32> to vector<8x32xf32>
    %371 = vector.extract_strided_slice %369 {offsets = [0, 32], sizes = [8, 32], strides = [1, 1]} : vector<8x128xf32> to vector<8x32xf32>
    %372 = vector.extract_strided_slice %369 {offsets = [0, 64], sizes = [8, 32], strides = [1, 1]} : vector<8x128xf32> to vector<8x32xf32>
    %373 = vector.extract_strided_slice %369 {offsets = [0, 96], sizes = [8, 32], strides = [1, 1]} : vector<8x128xf32> to vector<8x32xf32>
    %c0_206 = arith.constant 0 : index
    %c0_207 = arith.constant 0 : index
    %374 = vector.load %arg13[%c0_206, %c0_207] : memref<8x32xf32, #tpu.memory_space<vmem>>, vector<8x32xf32>
    %375 = arith.mulf %371, %374 : vector<8x32xf32>
    %376 = arith.mulf %370, %372 : vector<8x32xf32>
    %377 = arith.addf %375, %376 : vector<8x32xf32>
    %378 = math.tanh %377 : vector<8x32xf32>
    %379 = arith.mulf %373, %378 : vector<8x32xf32>
    %c0_208 = arith.constant 0 : index
    %c0_209 = arith.constant 0 : index
    %380 = vector.load %arg13[%c0_208, %c0_209] : memref<8x32xf32, #tpu.memory_space<vmem>>, vector<8x32xf32>
    tpu.vector_store %arg13[%c0_208, %c0_209], %377 {strides = array<i32>} : memref<8x32xf32, #tpu.memory_space<vmem>>, vector<8x32xf32>,
    %c0_210 = arith.constant 0 : index
    %c0_211 = arith.constant 0 : index
    %381 = vector.load %arg12[%c0_210, %c0_211] : memref<8x32xf32, #tpu.memory_space<vmem>>, vector<8x32xf32>
    tpu.vector_store %arg12[%c0_210, %c0_211], %379 {strides = array<i32>} : memref<8x32xf32, #tpu.memory_space<vmem>>, vector<8x32xf32>,
    %c4_i32_212 = arith.constant 4 : i32
    %c8_i32_213 = arith.constant 8 : i32
    %382 = arith.muli %c4_i32_212, %c8_i32_213 : i32
    %383 = tpu.assume_multiple %382, 8 : i32
    %c0_214 = arith.constant 0 : index
    %c0_215 = arith.constant 0 : index
    %384 = vector.load %arg12[%c0_214, %c0_215] : memref<8x32xf32, #tpu.memory_space<vmem>>, vector<8x32xf32>
    %cst_216 = arith.constant dense<0.000000e+00> : vector<8x128xf32>
    %385 = tpu.matmul %384, %265, %cst_216 {dimension_numbers = #tpu.dot_dimension_numbers<[1], [0], [0], [1], [0, 0, 1, 1], [], []>} : vector<8x32xf32>, vector<32x128xf32>, vector<8x128xf32> -> vector<8x128xf32>
    %386 = arith.index_cast %383 : i32 to index
    %c0_217 = arith.constant 0 : index
    %387 = vector.load %arg10[%386, %c0_217] : memref<64x128xf32, #tpu.memory_space<vmem>>, vector<8x128xf32>
    %388 = arith.addf %385, %387 : vector<8x128xf32>
    %cst_218 = arith.constant 5.000000e-01 : f32
    %389 = vector.broadcast %cst_218 : f32 to vector<8x128xf32>
    %390 = arith.mulf %389, %388 : vector<8x128xf32>
    %391 = arith.select %5, %388, %390 : vector<8x128xi1>, vector<8x128xf32>
    %392 = math.tanh %391 : vector<8x128xf32>
    %cst_219 = arith.constant 1.000000e+00 : f32
    %393 = vector.broadcast %cst_219 : f32 to vector<8x128xf32>
    %394 = arith.addf %392, %393 : vector<8x128xf32>
    %cst_220 = arith.constant 5.000000e-01 : f32
    %395 = vector.broadcast %cst_220 : f32 to vector<8x128xf32>
    %396 = arith.mulf %395, %394 : vector<8x128xf32>
    %397 = arith.select %5, %392, %396 : vector<8x128xi1>, vector<8x128xf32>
    %398 = vector.extract_strided_slice %397 {offsets = [0, 0], sizes = [8, 32], strides = [1, 1]} : vector<8x128xf32> to vector<8x32xf32>
    %399 = vector.extract_strided_slice %397 {offsets = [0, 32], sizes = [8, 32], strides = [1, 1]} : vector<8x128xf32> to vector<8x32xf32>
    %400 = vector.extract_strided_slice %397 {offsets = [0, 64], sizes = [8, 32], strides = [1, 1]} : vector<8x128xf32> to vector<8x32xf32>
    %401 = vector.extract_strided_slice %397 {offsets = [0, 96], sizes = [8, 32], strides = [1, 1]} : vector<8x128xf32> to vector<8x32xf32>
    %c0_221 = arith.constant 0 : index
    %c0_222 = arith.constant 0 : index
    %402 = vector.load %arg13[%c0_221, %c0_222] : memref<8x32xf32, #tpu.memory_space<vmem>>, vector<8x32xf32>
    %403 = arith.mulf %399, %402 : vector<8x32xf32>
    %404 = arith.mulf %398, %400 : vector<8x32xf32>
    %405 = arith.addf %403, %404 : vector<8x32xf32>
    %406 = math.tanh %405 : vector<8x32xf32>
    %407 = arith.mulf %401, %406 : vector<8x32xf32>
    %c0_223 = arith.constant 0 : index
    %c0_224 = arith.constant 0 : index
    %408 = vector.load %arg13[%c0_223, %c0_224] : memref<8x32xf32, #tpu.memory_space<vmem>>, vector<8x32xf32>
    tpu.vector_store %arg13[%c0_223, %c0_224], %405 {strides = array<i32>} : memref<8x32xf32, #tpu.memory_space<vmem>>, vector<8x32xf32>,
    %c0_225 = arith.constant 0 : index
    %c0_226 = arith.constant 0 : index
    %409 = vector.load %arg12[%c0_225, %c0_226] : memref<8x32xf32, #tpu.memory_space<vmem>>, vector<8x32xf32>
    tpu.vector_store %arg12[%c0_225, %c0_226], %407 {strides = array<i32>} : memref<8x32xf32, #tpu.memory_space<vmem>>, vector<8x32xf32>,
    %c5_i32_227 = arith.constant 5 : i32
    %c8_i32_228 = arith.constant 8 : i32
    %410 = arith.muli %c5_i32_227, %c8_i32_228 : i32
    %411 = tpu.assume_multiple %410, 8 : i32
    %c0_229 = arith.constant 0 : index
    %c0_230 = arith.constant 0 : index
    %412 = vector.load %arg12[%c0_229, %c0_230] : memref<8x32xf32, #tpu.memory_space<vmem>>, vector<8x32xf32>
    %cst_231 = arith.constant dense<0.000000e+00> : vector<8x128xf32>
    %413 = tpu.matmul %412, %265, %cst_231 {dimension_numbers = #tpu.dot_dimension_numbers<[1], [0], [0], [1], [0, 0, 1, 1], [], []>} : vector<8x32xf32>, vector<32x128xf32>, vector<8x128xf32> -> vector<8x128xf32>
    %414 = arith.index_cast %411 : i32 to index
    %c0_232 = arith.constant 0 : index
    %415 = vector.load %arg10[%414, %c0_232] : memref<64x128xf32, #tpu.memory_space<vmem>>, vector<8x128xf32>
    %416 = arith.addf %413, %415 : vector<8x128xf32>
    %cst_233 = arith.constant 5.000000e-01 : f32
    %417 = vector.broadcast %cst_233 : f32 to vector<8x128xf32>
    %418 = arith.mulf %417, %416 : vector<8x128xf32>
    %419 = arith.select %5, %416, %418 : vector<8x128xi1>, vector<8x128xf32>
    %420 = math.tanh %419 : vector<8x128xf32>
    %cst_234 = arith.constant 1.000000e+00 : f32
    %421 = vector.broadcast %cst_234 : f32 to vector<8x128xf32>
    %422 = arith.addf %420, %421 : vector<8x128xf32>
    %cst_235 = arith.constant 5.000000e-01 : f32
    %423 = vector.broadcast %cst_235 : f32 to vector<8x128xf32>
    %424 = arith.mulf %423, %422 : vector<8x128xf32>
    %425 = arith.select %5, %420, %424 : vector<8x128xi1>, vector<8x128xf32>
    %426 = vector.extract_strided_slice %425 {offsets = [0, 0], sizes = [8, 32], strides = [1, 1]} : vector<8x128xf32> to vector<8x32xf32>
    %427 = vector.extract_strided_slice %425 {offsets = [0, 32], sizes = [8, 32], strides = [1, 1]} : vector<8x128xf32> to vector<8x32xf32>
    %428 = vector.extract_strided_slice %425 {offsets = [0, 64], sizes = [8, 32], strides = [1, 1]} : vector<8x128xf32> to vector<8x32xf32>
    %429 = vector.extract_strided_slice %425 {offsets = [0, 96], sizes = [8, 32], strides = [1, 1]} : vector<8x128xf32> to vector<8x32xf32>
    %c0_236 = arith.constant 0 : index
    %c0_237 = arith.constant 0 : index
    %430 = vector.load %arg13[%c0_236, %c0_237] : memref<8x32xf32, #tpu.memory_space<vmem>>, vector<8x32xf32>
    %431 = arith.mulf %427, %430 : vector<8x32xf32>
    %432 = arith.mulf %426, %428 : vector<8x32xf32>
    %433 = arith.addf %431, %432 : vector<8x32xf32>
    %434 = math.tanh %433 : vector<8x32xf32>
    %435 = arith.mulf %429, %434 : vector<8x32xf32>
    %c0_238 = arith.constant 0 : index
    %c0_239 = arith.constant 0 : index
    %436 = vector.load %arg13[%c0_238, %c0_239] : memref<8x32xf32, #tpu.memory_space<vmem>>, vector<8x32xf32>
    tpu.vector_store %arg13[%c0_238, %c0_239], %433 {strides = array<i32>} : memref<8x32xf32, #tpu.memory_space<vmem>>, vector<8x32xf32>,
    %c0_240 = arith.constant 0 : index
    %c0_241 = arith.constant 0 : index
    %437 = vector.load %arg12[%c0_240, %c0_241] : memref<8x32xf32, #tpu.memory_space<vmem>>, vector<8x32xf32>
    tpu.vector_store %arg12[%c0_240, %c0_241], %435 {strides = array<i32>} : memref<8x32xf32, #tpu.memory_space<vmem>>, vector<8x32xf32>,
    %c6_i32_242 = arith.constant 6 : i32
    %c8_i32_243 = arith.constant 8 : i32
    %438 = arith.muli %c6_i32_242, %c8_i32_243 : i32
    %439 = tpu.assume_multiple %438, 8 : i32
    %c0_244 = arith.constant 0 : index
    %c0_245 = arith.constant 0 : index
    %440 = vector.load %arg12[%c0_244, %c0_245] : memref<8x32xf32, #tpu.memory_space<vmem>>, vector<8x32xf32>
    %cst_246 = arith.constant dense<0.000000e+00> : vector<8x128xf32>
    %441 = tpu.matmul %440, %265, %cst_246 {dimension_numbers = #tpu.dot_dimension_numbers<[1], [0], [0], [1], [0, 0, 1, 1], [], []>} : vector<8x32xf32>, vector<32x128xf32>, vector<8x128xf32> -> vector<8x128xf32>
    %442 = arith.index_cast %439 : i32 to index
    %c0_247 = arith.constant 0 : index
    %443 = vector.load %arg10[%442, %c0_247] : memref<64x128xf32, #tpu.memory_space<vmem>>, vector<8x128xf32>
    %444 = arith.addf %441, %443 : vector<8x128xf32>
    %cst_248 = arith.constant 5.000000e-01 : f32
    %445 = vector.broadcast %cst_248 : f32 to vector<8x128xf32>
    %446 = arith.mulf %445, %444 : vector<8x128xf32>
    %447 = arith.select %5, %444, %446 : vector<8x128xi1>, vector<8x128xf32>
    %448 = math.tanh %447 : vector<8x128xf32>
    %cst_249 = arith.constant 1.000000e+00 : f32
    %449 = vector.broadcast %cst_249 : f32 to vector<8x128xf32>
    %450 = arith.addf %448, %449 : vector<8x128xf32>
    %cst_250 = arith.constant 5.000000e-01 : f32
    %451 = vector.broadcast %cst_250 : f32 to vector<8x128xf32>
    %452 = arith.mulf %451, %450 : vector<8x128xf32>
    %453 = arith.select %5, %448, %452 : vector<8x128xi1>, vector<8x128xf32>
    %454 = vector.extract_strided_slice %453 {offsets = [0, 0], sizes = [8, 32], strides = [1, 1]} : vector<8x128xf32> to vector<8x32xf32>
    %455 = vector.extract_strided_slice %453 {offsets = [0, 32], sizes = [8, 32], strides = [1, 1]} : vector<8x128xf32> to vector<8x32xf32>
    %456 = vector.extract_strided_slice %453 {offsets = [0, 64], sizes = [8, 32], strides = [1, 1]} : vector<8x128xf32> to vector<8x32xf32>
    %457 = vector.extract_strided_slice %453 {offsets = [0, 96], sizes = [8, 32], strides = [1, 1]} : vector<8x128xf32> to vector<8x32xf32>
    %c0_251 = arith.constant 0 : index
    %c0_252 = arith.constant 0 : index
    %458 = vector.load %arg13[%c0_251, %c0_252] : memref<8x32xf32, #tpu.memory_space<vmem>>, vector<8x32xf32>
    %459 = arith.mulf %455, %458 : vector<8x32xf32>
    %460 = arith.mulf %454, %456 : vector<8x32xf32>
    %461 = arith.addf %459, %460 : vector<8x32xf32>
    %462 = math.tanh %461 : vector<8x32xf32>
    %463 = arith.mulf %457, %462 : vector<8x32xf32>
    %c0_253 = arith.constant 0 : index
    %c0_254 = arith.constant 0 : index
    %464 = vector.load %arg13[%c0_253, %c0_254] : memref<8x32xf32, #tpu.memory_space<vmem>>, vector<8x32xf32>
    tpu.vector_store %arg13[%c0_253, %c0_254], %461 {strides = array<i32>} : memref<8x32xf32, #tpu.memory_space<vmem>>, vector<8x32xf32>,
    %c0_255 = arith.constant 0 : index
    %c0_256 = arith.constant 0 : index
    %465 = vector.load %arg12[%c0_255, %c0_256] : memref<8x32xf32, #tpu.memory_space<vmem>>, vector<8x32xf32>
    tpu.vector_store %arg12[%c0_255, %c0_256], %463 {strides = array<i32>} : memref<8x32xf32, #tpu.memory_space<vmem>>, vector<8x32xf32>,
    %c7_i32_257 = arith.constant 7 : i32
    %c8_i32_258 = arith.constant 8 : i32
    %466 = arith.muli %c7_i32_257, %c8_i32_258 : i32
    %467 = tpu.assume_multiple %466, 8 : i32
    %c0_259 = arith.constant 0 : index
    %c0_260 = arith.constant 0 : index
    %468 = vector.load %arg12[%c0_259, %c0_260] : memref<8x32xf32, #tpu.memory_space<vmem>>, vector<8x32xf32>
    %cst_261 = arith.constant dense<0.000000e+00> : vector<8x128xf32>
    %469 = tpu.matmul %468, %265, %cst_261 {dimension_numbers = #tpu.dot_dimension_numbers<[1], [0], [0], [1], [0, 0, 1, 1], [], []>} : vector<8x32xf32>, vector<32x128xf32>, vector<8x128xf32> -> vector<8x128xf32>
    %470 = arith.index_cast %467 : i32 to index
    %c0_262 = arith.constant 0 : index
    %471 = vector.load %arg10[%470, %c0_262] : memref<64x128xf32, #tpu.memory_space<vmem>>, vector<8x128xf32>
    %472 = arith.addf %469, %471 : vector<8x128xf32>
    %cst_263 = arith.constant 5.000000e-01 : f32
    %473 = vector.broadcast %cst_263 : f32 to vector<8x128xf32>
    %474 = arith.mulf %473, %472 : vector<8x128xf32>
    %475 = arith.select %5, %472, %474 : vector<8x128xi1>, vector<8x128xf32>
    %476 = math.tanh %475 : vector<8x128xf32>
    %cst_264 = arith.constant 1.000000e+00 : f32
    %477 = vector.broadcast %cst_264 : f32 to vector<8x128xf32>
    %478 = arith.addf %476, %477 : vector<8x128xf32>
    %cst_265 = arith.constant 5.000000e-01 : f32
    %479 = vector.broadcast %cst_265 : f32 to vector<8x128xf32>
    %480 = arith.mulf %479, %478 : vector<8x128xf32>
    %481 = arith.select %5, %476, %480 : vector<8x128xi1>, vector<8x128xf32>
    %482 = vector.extract_strided_slice %481 {offsets = [0, 0], sizes = [8, 32], strides = [1, 1]} : vector<8x128xf32> to vector<8x32xf32>
    %483 = vector.extract_strided_slice %481 {offsets = [0, 32], sizes = [8, 32], strides = [1, 1]} : vector<8x128xf32> to vector<8x32xf32>
    %484 = vector.extract_strided_slice %481 {offsets = [0, 64], sizes = [8, 32], strides = [1, 1]} : vector<8x128xf32> to vector<8x32xf32>
    %485 = vector.extract_strided_slice %481 {offsets = [0, 96], sizes = [8, 32], strides = [1, 1]} : vector<8x128xf32> to vector<8x32xf32>
    %c0_266 = arith.constant 0 : index
    %c0_267 = arith.constant 0 : index
    %486 = vector.load %arg13[%c0_266, %c0_267] : memref<8x32xf32, #tpu.memory_space<vmem>>, vector<8x32xf32>
    %487 = arith.mulf %483, %486 : vector<8x32xf32>
    %488 = arith.mulf %482, %484 : vector<8x32xf32>
    %489 = arith.addf %487, %488 : vector<8x32xf32>
    %490 = math.tanh %489 : vector<8x32xf32>
    %491 = arith.mulf %485, %490 : vector<8x32xf32>
    %c0_268 = arith.constant 0 : index
    %c0_269 = arith.constant 0 : index
    %492 = vector.load %arg13[%c0_268, %c0_269] : memref<8x32xf32, #tpu.memory_space<vmem>>, vector<8x32xf32>
    tpu.vector_store %arg13[%c0_268, %c0_269], %489 {strides = array<i32>} : memref<8x32xf32, #tpu.memory_space<vmem>>, vector<8x32xf32>,
    %c0_270 = arith.constant 0 : index
    %c0_271 = arith.constant 0 : index
    %493 = vector.load %arg12[%c0_270, %c0_271] : memref<8x32xf32, #tpu.memory_space<vmem>>, vector<8x32xf32>
    tpu.vector_store %arg12[%c0_270, %c0_271], %491 {strides = array<i32>} : memref<8x32xf32, #tpu.memory_space<vmem>>, vector<8x32xf32>,
    %c8_i32_272 = arith.constant 8 : i32
    %c0_273 = arith.constant 0 : index
    %c0_274 = arith.constant 0 : index
    %494 = vector.load %arg12[%c0_273, %c0_274] : memref<8x32xf32, #tpu.memory_space<vmem>>, vector<8x32xf32>
    %c0_275 = arith.constant 0 : index
    %c0_276 = arith.constant 0 : index
    %495 = vector.load %arg7[%c0_275, %c0_276] : memref<32x4xf32, #tpu.memory_space<vmem>>, vector<32x4xf32>
    %cst_277 = arith.constant dense<0.000000e+00> : vector<8x4xf32>
    %496 = tpu.matmul %494, %495, %cst_277 {dimension_numbers = #tpu.dot_dimension_numbers<[1], [0], [0], [1], [0, 0, 1, 1], [], []>} : vector<8x32xf32>, vector<32x4xf32>, vector<8x4xf32> -> vector<8x4xf32>
    %c0_278 = arith.constant 0 : index
    %c0_279 = arith.constant 0 : index
    %497 = vector.load %arg8[%c0_278, %c0_279] : memref<1x4xf32, #tpu.memory_space<vmem>>, vector<1x4xf32>
    %498 = vector.broadcast %497 : vector<1x4xf32> to vector<8x4xf32>
    %499 = arith.addf %496, %498 : vector<8x4xf32>
    %c0_280 = arith.constant 0 : index
    %c0_281 = arith.constant 0 : index
    %500 = vector.load %arg9[%c0_280, %c0_281] : memref<8x4xf32, #tpu.memory_space<vmem>>, vector<8x4xf32>
    tpu.vector_store %arg9[%c0_280, %c0_281], %499 {strides = array<i32>} : memref<8x4xf32, #tpu.memory_space<vmem>>, vector<8x4xf32>,
    return
  }
}

</mosaic_0001>

<bundles_post_ra>
// kernel: lstm_model_forward.1
= control target key start
LH: loop header
LB: loop body
LE: loop exit
PB: predicated region body
PF: predicated region fallthrough
CT: control target
= control target key end

     0   :  { %vm129_vm0 = vcmask 261120   ;;  %v1399_v3 = vmov 0.0   ;;  %vm51_vm1 = vcmask 130048   ;;  %v32_v9 = vlaneseq  ;;  %s1401_s23 = smov 32   ;;  %s1402_s24 = smov 96   ;;  %s1891_s2 = inlined_call_operand.vmem [shape: f32[32,128], index: 2, kind: input, shape index: {}]   ;;  %s1892_s1 = inlined_call_operand.vmem [shape: f32[16,128], index: 1, kind: input, shape index: {}]   ;;  %s1893_s0 = inlined_call_operand.vmem [shape: f32[64,16], index: 0, kind: input, shape index: {}]   ;;  %s1894_s3 = inlined_call_operand.vmem [shape: f32[1,128], index: 3, kind: input, shape index: {}]   ;;  %s1895_s4 = inlined_call_operand.vmem [shape: f32[32,128], index: 4, kind: input, shape index: {}]   ;;  %s1896_s6 = inlined_call_operand.vmem [shape: f32[1,128], index: 6, kind: input, shape index: {}]   ;;  %s1897_s5 = inlined_call_operand.vmem [shape: f32[32,128], index: 5, kind: input, shape index: {}]   ;;  %s1898_s8 = inlined_call_operand.vmem [shape: f32[1,4], index: 8, kind: input, shape index: {}]   ;;  %s1899_s7 = inlined_call_operand.vmem [shape: f32[32,4], index: 7, kind: input, shape index: {}]   ;;  %s1900_s9 = inlined_call_operand.vmem [shape: f32[8,4], index: 9, kind: output, shape index: {}]  }
   0x1   :  { %v1456_v0 = vld [vmem:[%s1891_s2 + $0x18] sm:$0xff]  ;;  %v46_v1 = vld [vmem:[%s1892_s1 + $0x8] sm:$0xff]  ;;  %v1464_v2 = vld [vmem:[%s1891_s2 + $0x10] sm:$0xff]  ;;  %130 = vst.msk [vmem:[#allocation4] sm:$0xff] %vm129_vm0, %v1399_v3  ;;  %vm1289_vm5 = vcmask 31744  }
   0x2   :  { %149 = vmatpush.msra.mxu1 %v1456_v0  ;;  %90 = vmatpush.msra.mxu0 %v46_v1  ;;  %v45_v4 = vld [vmem:[%s1892_s1] sm:$0xff]  ;;  %131 = vst.msk [vmem:[#allocation5] sm:$0xff] %vm129_vm0, %v1399_v3  ;;  %v1480_v6 = vld [vmem:[%s1891_s2 + $0x8] sm:$0xff]  ;;  %v33_v11 = vand.u32 127, %v32_v9  ;;  %v669_v33 = vld [vmem:[%s1895_s4 + $0x18] sm:$0xff] }
   0x3   :  { %v37_v5 = vld [vmem:[%s1893_s0] sm:$0xff]  ;;  %214 = vmatpush.msra.mxu2 %v1456_v0  ;;  %v668_v34 = vld [vmem:[%s1895_s4 + $0x10] sm:$0xff]  ;;  %710 = vmatpush.msra.mxu3 %v669_v33  ;;  %v667_v35 = vld [vmem:[%s1895_s4 + $0x8] sm:$0xff] }
   0x4   :  { %150 = vmatpush.msra.mxu1 %v1464_v2  ;;  %91 = vmatpush.msra.mxu0 %v45_v4  ;;  %v1488_v7 = vld [vmem:[%s1891_s2] sm:$0xff]  ;;  %vm34_vm2 = vcmp.ge.s32.totalorder %v33_v11, 64  ;;  %vm35_vm3 = vcmp.lt.s32.totalorder %v33_v11, 96  ;;  %v38_v37 = vld [vmem:[%s1893_s0 + $0x8] sm:$0xff]  ;;  %v39_v1 = vld [vmem:[%s1893_s0 + $0x10] sm:$0xff] }
   0x5   :  { %1295 = vmatmul.msk.f32.vlgmr.msra.gmra.mxu0 %vm51_vm1, %v37_v5  ;;  %215 = vmatpush.msra.mxu2 %v1464_v2  ;;  %v1515_v10 = vld [vmem:[%s1894_s3] ss:$0 sm:$0xff]  ;;  %vm1518_vm4 = vmand %vm34_vm2, %vm35_vm3  ;;  %s1400_s3 = smov 64  }
   0x6   :  { %151 = vmatpush.msra.mxu1 %v1480_v6  ;;  %478 = vmatpush.msrb.mxu0 %v1456_v0  ;;  %v666_v36 = vld [vmem:[%s1895_s4] sm:$0xff] }
   0x7   :  { %216 = vmatpush.msra.mxu2 %v1480_v6  ;;  %711 = vmatpush.msra.mxu3 %v668_v34 }
   0x8   :  { %152 = vmatpush.msra.mxu1 %v1488_v7  ;;  %v132_v8 = vld [vmem:[#allocation4] sm:$0xff]  ;;  %479 = vmatpush.msrb.mxu0 %v1464_v2 }
   0x9   :  { %1303 = vmatmul.msk.f32.vlgmr.msra.gmra.mxu1 %vm129_vm0, %v132_v8  ;;  %217 = vmatpush.msra.mxu2 %v1488_v7  ;;  %v163_v23 = vld [vmem:[#allocation5] sm:$0xff] }
   0xa   :  { %346 = vmatpush.msrb.mxu1 %v1456_v0  ;;  %480 = vmatpush.msrb.mxu0 %v1480_v6 }
   0xb   :  { %280 = vmatpush.msrb.mxu2 %v1456_v0  ;;  %712 = vmatpush.msra.mxu3 %v667_v35 }
   0xc   :  { %347 = vmatpush.msrb.mxu1 %v1464_v2  ;;  %481 = vmatpush.msrb.mxu0 %v1488_v7 }
   0xd   :  { %281 = vmatpush.msrb.mxu2 %v1464_v2  ;;  %713 = vmatpush.msra.mxu3 %v666_v36 }
   0xe   :  { %348 = vmatpush.msrb.mxu1 %v1480_v6  ;;  %1296 = vmatmul.msk.f32.gmra.mxu0 %vm51_vm1, %v38_v37 }
   0xf   :  { %282 = vmatpush.msrb.mxu2 %v1480_v6 }
  0x10   :  { %349 = vmatpush.msrb.mxu1 %v1488_v7 }
  0x11   :  { %283 = vmatpush.msrb.mxu2 %v1488_v7 }
  0x12   :  { %544 = vmatpush.msra.mxu1 %v1456_v0 }
  0x14   :  { %545 = vmatpush.msra.mxu1 %v1464_v2 }
  0x16   :  { %546 = vmatpush.msra.mxu1 %v1480_v6  ;;  %1297 = vmatmul.msk.f32.gmra.mxu0 %vm51_vm1, %v39_v1 }
  0x18   :  { %547 = vmatpush.msra.mxu1 %v1488_v7 }
  0x82   :  { %v93_v12 = vpop.f32.mrf.mxu0 }
  0x83   :  { %v94_v13 = vadd.f32 %v1515_v10, %v93_v12 }
  0x86   :  { %v154_v14 = vpop.f32.mrf.mxu1 }
  0x87   :  { %v155_v15 = vadd.f32 %v154_v14, %v94_v13 }
  0x89   :  { %v157_v17 = vmul.f32 0.5, %v155_v15 }
  0x8b   :  { %v158_v18 = vsel %vm1518_vm4, %v155_v15, %v157_v17  ;;  %v96_v43 = vpop.f32.mrf.mxu0 }
  0x8c   :  { %1335 = vtanh.f32 %v158_v18  ;;  %v97_v44 = vadd.f32 %v1515_v10, %v96_v43 }
  0x92   :  { %v1336_v19 = vpop.eup %1335 }
  0x93   :  { %v160_v20 = vadd.f32 1.0, %v1336_v19  ;;  %v99_v9 = vpop.f32.mrf.mxu0 }
  0x94   :  { %v100_v11 = vadd.f32 %v1515_v10, %v99_v9 }
  0x95   :  { %v161_v21 = vmul.f32 0.5, %v160_v20 }
  0x97   :  { %v162_v22 = vsel %vm1518_vm4, %v1336_v19, %v161_v21 }
  0x98   :  { %170 = vrot.lane.b32.xlu0 %v162_v22, %s1400_s3 }
  0xa0   :  { %165 = vrot.lane.b32.xlu0 %v163_v23, %s1401_s23 }
 0x10a   :  { %v171_v24 = vpop.permute.xlu0 %170 }
 0x10b   :  { %v173_v25 = vmul.f32 %v171_v24, %v162_v22 }
 0x10d   :  { %175 = vrot.lane.b32.xlu1 %v173_v25, %s1401_s23 }
 0x112   :  { %v166_v26 = vpop.permute.xlu0 %165 }
 0x113   :  { %v168_v27 = vmul.f32 %v166_v26, %v162_v22 }
 0x17f   :  { %v176_v28 = vpop.permute.xlu1 %175 }
 0x180   :  { %v178_v29 = vadd.f32 %v176_v28, %v168_v27  ;;  %v40_v28 = vld [vmem:[%s1893_s0 + $0x18] sm:$0xff] }
 0x181   :  { %1298 = vmatmul.msk.f32.gmra.mxu0 %vm51_vm1, %v40_v28 }
 0x182   :  { %1337 = vtanh.f32 %v178_v29 }
 0x188   :  { %v1338_v30 = vpop.eup %1337 }
 0x189   :  { %181 = vrot.lane.b32.xlu1 %v1338_v30, %s1400_s3 }
 0x1fb   :  { %v182_v31 = vpop.permute.xlu1 %181 }
 0x1fc   :  { %v184_v32 = vmul.f32 %v182_v31, %v162_v22 }
 0x1fe   :  { %191 = vrot.lane.b32.xlu2 %v184_v32, %s1401_s23  ;;  %v102_v32 = vpop.f32.mrf.mxu0 }
 0x1ff   :  { %v103_v33 = vadd.f32 %v1515_v10, %v102_v32 }
 0x206   :  { %186 = vrot.lane.b32.xlu2 %v178_v29, %s1402_s24 }
 0x258   :  { %v192_v38 = vpop.permute.xlu2 %191 }
 0x259   :  { %194 = vst.msk [vmem:[#allocation4] sm:$0xff] %vm129_vm0, %v192_v38 }
 0x25a   :  { %195 = vst.msk [vmem:[#allocation3] sm:$0xff] %vm129_vm0, %v192_v38 }
 0x260   :  { %v187_v39 = vpop.permute.xlu2 %186  ;;  %v196_v40 = vld [vmem:[#allocation4] sm:$0xff] }
 0x261   :  { %189 = vst.msk [vmem:[#allocation5] sm:$0xff] %vm129_vm0, %v187_v39  ;;  %1304 = vmatmul.msk.f32.vlgmr.msra.gmra.mxu2 %vm129_vm0, %v196_v40  ;;  %v658_v41 = vld [vmem:[#allocation3] sm:$0xff] }
 0x262   :  { %1311 = vmatmul.msk.f32.vlgmr.msra.gmra.mxu3 %vm129_vm0, %v658_v41  ;;  %412 = vmatpush.msra.mxu2 %v1456_v0 }
 0x264   :  { %413 = vmatpush.msra.mxu2 %v1464_v2 }
 0x266   :  { %414 = vmatpush.msra.mxu2 %v1480_v6 }
 0x268   :  { %v228_v42 = vld [vmem:[#allocation5] sm:$0xff]  ;;  %415 = vmatpush.msra.mxu2 %v1488_v7 }
 0x269   :  { %230 = vrot.lane.b32.xlu1 %v228_v42, %s1401_s23 }
 0x2db   :  { %v231_v55 = vpop.permute.xlu1 %230 }
 0x2e4   :  { %v219_v45 = vpop.f32.mrf.mxu2 }
 0x2e5   :  { %v220_v46 = vadd.f32 %v219_v45, %v97_v44 }
 0x2e7   :  { %v222_v47 = vmul.f32 0.5, %v220_v46 }
 0x2e9   :  { %v223_v48 = vsel %vm1518_vm4, %v220_v46, %v222_v47 }
 0x2ea   :  { %1339 = vtanh.f32 %v223_v48 }
 0x2f0   :  { %v1340_v49 = vpop.eup %1339 }
 0x2f1   :  { %v225_v50 = vadd.f32 1.0, %v1340_v49 }
 0x2f3   :  { %v226_v51 = vmul.f32 0.5, %v225_v50 }
 0x2f5   :  { %v227_v52 = vsel %vm1518_vm4, %v1340_v49, %v226_v51 }
 0x2f6   :  { %235 = vrot.lane.b32.xlu0 %v227_v52, %s1400_s3  ;;  %v233_v56 = vmul.f32 %v231_v55, %v227_v52 }
 0x368   :  { %v236_v53 = vpop.permute.xlu0 %235 }
 0x369   :  { %v238_v54 = vmul.f32 %v236_v53, %v227_v52  ;;  %v41_v53 = vld [vmem:[%s1893_s0 + $0x20] sm:$0xff] }
 0x36a   :  { %1299 = vmatmul.msk.f32.gmra.mxu0 %vm51_vm1, %v41_v53 }
 0x36b   :  { %240 = vrot.lane.b32.xlu2 %v238_v54, %s1401_s23 }
 0x3c5   :  { %v241_v57 = vpop.permute.xlu2 %240 }
 0x3c6   :  { %v243_v58 = vadd.f32 %v241_v57, %v233_v56 }
 0x3c8   :  { %1341 = vtanh.f32 %v243_v58  ;;  %251 = vrot.lane.b32.xlu2 %v243_v58, %s1402_s24 }
 0x3ce   :  { %v1342_v59 = vpop.eup %1341 }
 0x3cf   :  { %246 = vrot.lane.b32.xlu0 %v1342_v59, %s1400_s3 }
 0x3e7   :  { %v105_v57 = vpop.f32.mrf.mxu0 }
 0x3e8   :  { %v106_v58 = vadd.f32 %v1515_v10, %v105_v57 }
 0x422   :  { %v252_v60 = vpop.permute.xlu2 %251 }
 0x423   :  { %254 = vst.msk [vmem:[#allocation5] sm:$0xff] %vm129_vm0, %v252_v60 }
 0x42a   :  { %v294_v63 = vld [vmem:[#allocation5] sm:$0xff] }
 0x441   :  { %v247_v61 = vpop.permute.xlu0 %246 }
 0x442   :  { %v249_v62 = vmul.f32 %v247_v61, %v227_v52 }
 0x444   :  { %256 = vrot.lane.b32.xlu1 %v249_v62, %s1401_s23 }
 0x44c   :  { %296 = vrot.lane.b32.xlu1 %v294_v63, %s1401_s23 }
 0x4b6   :  { %v257_v4 = vpop.permute.xlu1 %256 }
 0x4b7   :  { %259 = vst.msk [vmem:[#allocation4] sm:$0xff] %vm129_vm0, %v257_v4 }
 0x4b8   :  { %261 = vst.msk [vmem:[#allocation3 + $0x8] sm:$0xff] %vm129_vm0, %v257_v4 }
 0x4be   :  { %v262_v5 = vld [vmem:[#allocation4] sm:$0xff] }
 0x4bf   :  { %1305 = vmatmul.msk.f32.vlgmr.msrb.gmra.mxu2 %vm129_vm0, %v262_v5  ;;  %v659_v8 = vld [vmem:[#allocation3 + $0x8] sm:$0xff] }
 0x4c0   :  { %1312 = vmatmul.msk.f32.gmra.mxu3 %vm129_vm0, %v659_v8  ;;  %610 = vmatpush.msrb.mxu2 %v1456_v0 }
 0x4c2   :  { %611 = vmatpush.msrb.mxu2 %v1464_v2 }
 0x4c4   :  { %612 = vmatpush.msrb.mxu2 %v1480_v6 }
 0x4c6   :  { %613 = vmatpush.msrb.mxu2 %v1488_v7  ;;  %v297_v7 = vpop.permute.xlu1 %296 }
 0x542   :  { %v285_v12 = vpop.f32.mrf.mxu2 }
 0x543   :  { %v286_v13 = vadd.f32 %v285_v12, %v100_v11 }
 0x545   :  { %v288_v14 = vmul.f32 0.5, %v286_v13 }
 0x547   :  { %v289_v15 = vsel %vm1518_vm4, %v286_v13, %v288_v14 }
 0x548   :  { %1343 = vtanh.f32 %v289_v15 }
 0x54e   :  { %v1344_v17 = vpop.eup %1343 }
 0x54f   :  { %v291_v18 = vadd.f32 1.0, %v1344_v17 }
 0x551   :  { %v292_v19 = vmul.f32 0.5, %v291_v18  ;;  %v42_v18 = vld [vmem:[%s1893_s0 + $0x28] sm:$0xff] }
 0x552   :  { %1300 = vmatmul.msk.f32.gmra.mxu0 %vm51_vm1, %v42_v18 }
 0x553   :  { %v293_v0 = vsel %vm1518_vm4, %v1344_v17, %v292_v19  ;;  %v43_v19 = vld [vmem:[%s1893_s0 + $0x30] sm:$0xff] }
 0x554   :  { %301 = vrot.lane.b32.xlu0 %v293_v0, %s1400_s3  ;;  %v299_v20 = vmul.f32 %v297_v7, %v293_v0  ;;  %v44_v7 = vld [vmem:[%s1893_s0 + $0x38] sm:$0xff] }
 0x55a   :  { %1301 = vmatmul.msk.f32.gmra.mxu0 %vm51_vm1, %v43_v19 }
 0x562   :  { %1302 = vmatmul.msk.f32.gmra.mxu0 %vm51_vm1, %v44_v7 }
 0x5c6   :  { %v302_v2 = vpop.permute.xlu0 %301 }
 0x5c7   :  { %v304_v6 = vmul.f32 %v302_v2, %v293_v0 }
 0x5c9   :  { %306 = vrot.lane.b32.xlu2 %v304_v6, %s1401_s23 }
 0x623   :  { %v307_v21 = vpop.permute.xlu2 %306 }
 0x624   :  { %v309_v22 = vadd.f32 %v307_v21, %v299_v20 }
 0x626   :  { %1345 = vtanh.f32 %v309_v22  ;;  %317 = vrot.lane.b32.xlu2 %v309_v22, %s1402_s24 }
 0x62c   :  { %v1346_v23 = vpop.eup %1345 }
 0x62d   :  { %312 = vrot.lane.b32.xlu0 %v1346_v23, %s1400_s3  ;;  %v108_v23 = vpop.f32.mrf.mxu0 }
 0x680   :  { %v318_v24 = vpop.permute.xlu2 %317 }
 0x681   :  { %320 = vst.msk [vmem:[#allocation5] sm:$0xff] %vm129_vm0, %v318_v24  ;;  %v111_v24 = vpop.f32.mrf.mxu0 }
 0x688   :  { %v360_v27 = vld [vmem:[#allocation5] sm:$0xff] }
 0x69f   :  { %v313_v25 = vpop.permute.xlu0 %312 }
 0x6a0   :  { %v315_v26 = vmul.f32 %v313_v25, %v293_v0  ;;  %v1650_v25 = vpop.f32.mrf.mxu0 }
 0x6a2   :  { %322 = vrot.lane.b32.xlu1 %v315_v26, %s1401_s23  ;;  %v109_v26 = vadd.f32 %v1515_v10, %v108_v23 }
 0x6aa   :  { %362 = vrot.lane.b32.xlu1 %v360_v27, %s1401_s23 }
 0x714   :  { %v323_v29 = vpop.permute.xlu1 %322 }
 0x715   :  { %325 = vst.msk [vmem:[#allocation4] sm:$0xff] %vm129_vm0, %v323_v29 }
 0x716   :  { %327 = vst.msk [vmem:[#allocation3 + $0x10] sm:$0xff] %vm129_vm0, %v323_v29 }
 0x71c   :  { %v328_v30 = vld [vmem:[#allocation4] sm:$0xff]  ;;  %v363_v44 = vpop.permute.xlu1 %362 }
 0x71d   :  { %1306 = vmatmul.msk.f32.vlgmr.msrb.gmra.mxu1 %vm129_vm0, %v328_v30  ;;  %v660_v31 = vld [vmem:[#allocation3 + $0x10] sm:$0xff] }
 0x71e   :  { %1313 = vmatmul.msk.f32.gmra.mxu3 %vm129_vm0, %v660_v31 }
 0x79a   :  { %v351_v34 = vpop.f32.mrf.mxu1 }
 0x79b   :  { %v352_v35 = vadd.f32 %v351_v34, %v103_v33 }
 0x79d   :  { %v354_v36 = vmul.f32 0.5, %v352_v35 }
 0x79f   :  { %v355_v37 = vsel %vm1518_vm4, %v352_v35, %v354_v36 }
 0x7a0   :  { %1347 = vtanh.f32 %v355_v37 }
 0x7a6   :  { %v1348_v38 = vpop.eup %1347 }
 0x7a7   :  { %v357_v39 = vadd.f32 1.0, %v1348_v38 }
 0x7a9   :  { %v358_v40 = vmul.f32 0.5, %v357_v39 }
 0x7ab   :  { %v359_v41 = vsel %vm1518_vm4, %v1348_v38, %v358_v40 }
 0x7ac   :  { %367 = vrot.lane.b32.xlu0 %v359_v41, %s1400_s3  ;;  %v365_v45 = vmul.f32 %v363_v44, %v359_v41 }
 0x81e   :  { %v368_v42 = vpop.permute.xlu0 %367 }
 0x81f   :  { %v370_v43 = vmul.f32 %v368_v42, %v359_v41 }
 0x821   :  { %372 = vrot.lane.b32.xlu2 %v370_v43, %s1401_s23 }
 0x87b   :  { %v373_v46 = vpop.permute.xlu2 %372 }
 0x87c   :  { %v375_v47 = vadd.f32 %v373_v46, %v365_v45 }
 0x87e   :  { %1349 = vtanh.f32 %v375_v47  ;;  %383 = vrot.lane.b32.xlu2 %v375_v47, %s1402_s24 }
 0x884   :  { %v1350_v48 = vpop.eup %1349 }
 0x885   :  { %378 = vrot.lane.b32.xlu0 %v1350_v48, %s1400_s3 }
 0x8d8   :  { %v384_v49 = vpop.permute.xlu2 %383 }
 0x8d9   :  { %386 = vst.msk [vmem:[#allocation5] sm:$0xff] %vm129_vm0, %v384_v49  ;;  %v112_v49 = vadd.f32 %v1515_v10, %v111_v24 }
 0x8e0   :  { %v426_v52 = vld [vmem:[#allocation5] sm:$0xff] }
 0x8f7   :  { %v379_v50 = vpop.permute.xlu0 %378 }
 0x8f8   :  { %v381_v51 = vmul.f32 %v379_v50, %v359_v41 }
 0x8fa   :  { %388 = vrot.lane.b32.xlu1 %v381_v51, %s1401_s23 }
 0x902   :  { %428 = vrot.lane.b32.xlu1 %v426_v52, %s1401_s23 }
 0x96c   :  { %v389_v54 = vpop.permute.xlu1 %388 }
 0x96d   :  { %391 = vst.msk [vmem:[#allocation4] sm:$0xff] %vm129_vm0, %v389_v54 }
 0x96e   :  { %393 = vst.msk [vmem:[#allocation3 + $0x18] sm:$0xff] %vm129_vm0, %v389_v54 }
 0x974   :  { %v394_v55 = vld [vmem:[#allocation4] sm:$0xff]  ;;  %v429_v11 = vpop.permute.xlu1 %428 }
 0x975   :  { %1307 = vmatmul.msk.f32.vlgmr.msra.gmra.mxu2 %vm129_vm0, %v394_v55  ;;  %v661_v56 = vld [vmem:[#allocation3 + $0x18] sm:$0xff] }
 0x976   :  { %1314 = vmatmul.msk.f32.gmra.mxu3 %vm129_vm0, %v661_v56 }
 0x9f8   :  { %v417_v59 = vpop.f32.mrf.mxu2 }
 0x9f9   :  { %v418_v60 = vadd.f32 %v417_v59, %v106_v58 }
 0x9fb   :  { %v420_v61 = vmul.f32 0.5, %v418_v60 }
 0x9fd   :  { %v421_v62 = vsel %vm1518_vm4, %v418_v60, %v420_v61 }
 0x9fe   :  { %1351 = vtanh.f32 %v421_v62 }
 0xa04   :  { %v1352_v63 = vpop.eup %1351 }
 0xa05   :  { %v423_v1 = vadd.f32 1.0, %v1352_v63 }
 0xa07   :  { %v424_v4 = vmul.f32 0.5, %v423_v1 }
 0xa09   :  { %v425_v5 = vsel %vm1518_vm4, %v1352_v63, %v424_v4 }
 0xa0a   :  { %433 = vrot.lane.b32.xlu0 %v425_v5, %s1400_s3  ;;  %v431_v12 = vmul.f32 %v429_v11, %v425_v5 }
 0xa7c   :  { %v434_v8 = vpop.permute.xlu0 %433 }
 0xa7d   :  { %v436_v9 = vmul.f32 %v434_v8, %v425_v5 }
 0xa7f   :  { %438 = vrot.lane.b32.xlu2 %v436_v9, %s1401_s23 }
 0xad9   :  { %v439_v13 = vpop.permute.xlu2 %438 }
 0xada   :  { %v441_v14 = vadd.f32 %v439_v13, %v431_v12 }
 0xadc   :  { %1353 = vtanh.f32 %v441_v14  ;;  %449 = vrot.lane.b32.xlu2 %v441_v14, %s1402_s24  ;;  %v115_v14 = vadd.f32 %v1515_v10, %v1650_v25 }
 0xae2   :  { %v1354_v15 = vpop.eup %1353 }
 0xae3   :  { %444 = vrot.lane.b32.xlu0 %v1354_v15, %s1400_s3 }
 0xb36   :  { %v450_v17 = vpop.permute.xlu2 %449 }
 0xb37   :  { %452 = vst.msk [vmem:[#allocation5] sm:$0xff] %vm129_vm0, %v450_v17 }
 0xb3e   :  { %v492_v6 = vld [vmem:[#allocation5] sm:$0xff] }
 0xb55   :  { %v445_v0 = vpop.permute.xlu0 %444 }
 0xb56   :  { %v447_v2 = vmul.f32 %v445_v0, %v425_v5 }
 0xb58   :  { %454 = vrot.lane.b32.xlu1 %v447_v2, %s1401_s23 }
 0xb60   :  { %494 = vrot.lane.b32.xlu1 %v492_v6, %s1401_s23 }
 0xbca   :  { %v455_v20 = vpop.permute.xlu1 %454 }
 0xbcb   :  { %457 = vst.msk [vmem:[#allocation4] sm:$0xff] %vm129_vm0, %v455_v20 }
 0xbcc   :  { %459 = vst.msk [vmem:[#allocation3 + $0x20] sm:$0xff] %vm129_vm0, %v455_v20 }
 0xbd2   :  { %v460_v21 = vld [vmem:[#allocation4] sm:$0xff]  ;;  %v495_v37 = vpop.permute.xlu1 %494 }
 0xbd3   :  { %1308 = vmatmul.msk.f32.vlgmr.msrb.gmra.mxu0 %vm129_vm0, %v460_v21  ;;  %v662_v22 = vld [vmem:[#allocation3 + $0x20] sm:$0xff] }
 0xbd4   :  { %1315 = vmatmul.msk.f32.gmra.mxu3 %vm129_vm0, %v662_v22 }
 0xc50   :  { %v483_v27 = vpop.f32.mrf.mxu0 }
 0xc51   :  { %v484_v28 = vadd.f32 %v483_v27, %v109_v26 }
 0xc53   :  { %v486_v29 = vmul.f32 0.5, %v484_v28 }
 0xc55   :  { %v487_v30 = vsel %vm1518_vm4, %v484_v28, %v486_v29  ;;  %v1701_v29 = vld [vmem:[%s1897_s5 + $0x18] sm:$0xff] }
 0xc56   :  { %1355 = vtanh.f32 %v487_v30  ;;  %v1706_v30 = vld [vmem:[%s1897_s5 + $0x10] sm:$0xff]  ;;  %770 = vmatpush.msrb.mxu1 %v1701_v29  ;;  %833 = vmatpush.msra.mxu2 %v1701_v29 }
 0xc58   :  { %771 = vmatpush.msrb.mxu1 %v1706_v30  ;;  %834 = vmatpush.msra.mxu2 %v1706_v30 }
 0xc5c   :  { %v1356_v31 = vpop.eup %1355 }
 0xc5d   :  { %v489_v32 = vadd.f32 1.0, %v1356_v31 }
 0xc5f   :  { %v490_v33 = vmul.f32 0.5, %v489_v32  ;;  %v1720_v32 = vld [vmem:[%s1897_s5] sm:$0xff] }
 0xc61   :  { %v491_v34 = vsel %vm1518_vm4, %v1356_v31, %v490_v33  ;;  %v1713_v31 = vld [vmem:[%s1897_s5 + $0x8] sm:$0xff] }
 0xc62   :  { %499 = vrot.lane.b32.xlu0 %v491_v34, %s1400_s3  ;;  %v497_v38 = vmul.f32 %v495_v37, %v491_v34  ;;  %772 = vmatpush.msrb.mxu1 %v1713_v31  ;;  %v1748_v37 = vld [vmem:[%s1896_s6] ss:$0 sm:$0xff] }
 0xc63   :  { %835 = vmatpush.msra.mxu2 %v1713_v31 }
 0xc64   :  { %773 = vmatpush.msrb.mxu1 %v1720_v32 }
 0xc65   :  { %836 = vmatpush.msra.mxu2 %v1720_v32 }
 0xcd4   :  { %v500_v35 = vpop.permute.xlu0 %499 }
 0xcd5   :  { %v502_v36 = vmul.f32 %v500_v35, %v491_v34 }
 0xcd7   :  { %504 = vrot.lane.b32.xlu2 %v502_v36, %s1401_s23 }
 0xd31   :  { %v505_v39 = vpop.permute.xlu2 %504 }
 0xd32   :  { %v507_v40 = vadd.f32 %v505_v39, %v497_v38 }
 0xd34   :  { %1357 = vtanh.f32 %v507_v40  ;;  %515 = vrot.lane.b32.xlu2 %v507_v40, %s1402_s24 }
 0xd3a   :  { %v1358_v41 = vpop.eup %1357 }
 0xd3b   :  { %510 = vrot.lane.b32.xlu0 %v1358_v41, %s1400_s3 }
 0xd8e   :  { %v516_v42 = vpop.permute.xlu2 %515 }
 0xd8f   :  { %518 = vst.msk [vmem:[#allocation5] sm:$0xff] %vm129_vm0, %v516_v42 }
 0xd96   :  { %v558_v45 = vld [vmem:[#allocation5] sm:$0xff] }
 0xdad   :  { %v511_v43 = vpop.permute.xlu0 %510 }
 0xdae   :  { %v513_v44 = vmul.f32 %v511_v43, %v491_v34 }
 0xdb0   :  { %520 = vrot.lane.b32.xlu1 %v513_v44, %s1401_s23 }
 0xdb8   :  { %560 = vrot.lane.b32.xlu1 %v558_v45, %s1401_s23 }
 0xe22   :  { %v521_v46 = vpop.permute.xlu1 %520 }
 0xe23   :  { %523 = vst.msk [vmem:[#allocation4] sm:$0xff] %vm129_vm0, %v521_v46 }
 0xe24   :  { %525 = vst.msk [vmem:[#allocation3 + $0x28] sm:$0xff] %vm129_vm0, %v521_v46 }
 0xe2a   :  { %v526_v47 = vld [vmem:[#allocation4] sm:$0xff]  ;;  %v561_v60 = vpop.permute.xlu1 %560 }
 0xe2b   :  { %1309 = vmatmul.msk.f32.vlgmr.msra.gmra.mxu1 %vm129_vm0, %v526_v47  ;;  %v663_v48 = vld [vmem:[#allocation3 + $0x28] sm:$0xff] }
 0xe2c   :  { %1316 = vmatmul.msk.f32.gmra.mxu3 %vm129_vm0, %v663_v48  ;;  %896 = vmatpush.msra.mxu1 %v1701_v29 }
 0xe2e   :  { %897 = vmatpush.msra.mxu1 %v1706_v30 }
 0xe30   :  { %898 = vmatpush.msra.mxu1 %v1713_v31 }
 0xe32   :  { %899 = vmatpush.msra.mxu1 %v1720_v32 }
 0xea8   :  { %v549_v50 = vpop.f32.mrf.mxu1 }
 0xea9   :  { %v550_v51 = vadd.f32 %v549_v50, %v112_v49 }
 0xeab   :  { %v552_v52 = vmul.f32 0.5, %v550_v51 }
 0xead   :  { %v553_v53 = vsel %vm1518_vm4, %v550_v51, %v552_v52 }
 0xeae   :  { %1359 = vtanh.f32 %v553_v53 }
 0xeb4   :  { %v1360_v54 = vpop.eup %1359 }
 0xeb5   :  { %v555_v55 = vadd.f32 1.0, %v1360_v54 }
 0xeb7   :  { %v556_v56 = vmul.f32 0.5, %v555_v55 }
 0xeb9   :  { %v557_v57 = vsel %vm1518_vm4, %v1360_v54, %v556_v56 }
 0xeba   :  { %565 = vrot.lane.b32.xlu0 %v557_v57, %s1400_s3  ;;  %v563_v61 = vmul.f32 %v561_v60, %v557_v57 }
 0xf2c   :  { %v566_v58 = vpop.permute.xlu0 %565 }
 0xf2d   :  { %v568_v59 = vmul.f32 %v566_v58, %v557_v57 }
 0xf2f   :  { %570 = vrot.lane.b32.xlu2 %v568_v59, %s1401_s23 }
 0xf89   :  { %v571_v62 = vpop.permute.xlu2 %570 }
 0xf8a   :  { %v573_v63 = vadd.f32 %v571_v62, %v563_v61 }
 0xf8c   :  { %1361 = vtanh.f32 %v573_v63  ;;  %581 = vrot.lane.b32.xlu2 %v573_v63, %s1402_s24 }
 0xf92   :  { %v1362_v1 = vpop.eup %1361 }
 0xf93   :  { %576 = vrot.lane.b32.xlu0 %v1362_v1, %s1400_s3 }
 0xfe6   :  { %v582_v4 = vpop.permute.xlu2 %581 }
 0xfe7   :  { %584 = vst.msk [vmem:[#allocation5] sm:$0xff] %vm129_vm0, %v582_v4 }
 0xfee   :  { %v624_v9 = vld [vmem:[#allocation5] sm:$0xff] }
0x1005   :  { %v577_v5 = vpop.permute.xlu0 %576 }
0x1006   :  { %v579_v8 = vmul.f32 %v577_v5, %v557_v57 }
0x1008   :  { %586 = vrot.lane.b32.xlu1 %v579_v8, %s1401_s23 }
0x1010   :  { %626 = vrot.lane.b32.xlu1 %v624_v9, %s1401_s23 }
0x107a   :  { %v587_v11 = vpop.permute.xlu1 %586 }
0x107b   :  { %589 = vst.msk [vmem:[#allocation4] sm:$0xff] %vm129_vm0, %v587_v11 }
0x107c   :  { %591 = vst.msk [vmem:[#allocation3 + $0x30] sm:$0xff] %vm129_vm0, %v587_v11 }
0x1082   :  { %v592_v12 = vld [vmem:[#allocation4] sm:$0xff]  ;;  %v627_v10 = vpop.permute.xlu1 %626 }
0x1083   :  { %1310 = vmatmul.msk.f32.vlgmr.msrb.gmra.mxu2 %vm129_vm0, %v592_v12  ;;  %v664_v13 = vld [vmem:[#allocation3 + $0x30] sm:$0xff] }
0x1084   :  { %1317 = vmatmul.msk.f32.gmra.mxu3 %vm129_vm0, %v664_v13  ;;  %959 = vmatpush.msrb.mxu2 %v1701_v29 }
0x1086   :  { %960 = vmatpush.msrb.mxu2 %v1706_v30 }
0x1088   :  { %961 = vmatpush.msrb.mxu2 %v1713_v31 }
0x108a   :  { %962 = vmatpush.msrb.mxu2 %v1720_v32 }
0x1106   :  { %v615_v15 = vpop.f32.mrf.mxu2 }
0x1107   :  { %v616_v17 = vadd.f32 %v615_v15, %v115_v14 }
0x1109   :  { %v618_v18 = vmul.f32 0.5, %v616_v17 }
0x110b   :  { %v619_v19 = vsel %vm1518_vm4, %v616_v17, %v618_v18 }
0x110c   :  { %1363 = vtanh.f32 %v619_v19 }
0x1112   :  { %v1364_v0 = vpop.eup %1363 }
0x1113   :  { %v621_v2 = vadd.f32 1.0, %v1364_v0 }
0x1115   :  { %v622_v6 = vmul.f32 0.5, %v621_v2 }
0x1117   :  { %v623_v7 = vsel %vm1518_vm4, %v1364_v0, %v622_v6 }
0x1118   :  { %631 = vrot.lane.b32.xlu0 %v623_v7, %s1400_s3  ;;  %v629_v22 = vmul.f32 %v627_v10, %v623_v7 }
0x118a   :  { %v632_v20 = vpop.permute.xlu0 %631 }
0x118b   :  { %v634_v21 = vmul.f32 %v632_v20, %v623_v7 }
0x118d   :  { %636 = vrot.lane.b32.xlu2 %v634_v21, %s1401_s23 }
0x11e7   :  { %v637_v23 = vpop.permute.xlu2 %636 }
0x11e8   :  { %v639_v24 = vadd.f32 %v637_v23, %v629_v22 }
0x11ea   :  { %1365 = vtanh.f32 %v639_v24  ;;  %647 = vrot.lane.b32.xlu2 %v639_v24, %s1402_s24 }
0x11f0   :  { %v1366_v25 = vpop.eup %1365 }
0x11f1   :  { %642 = vrot.lane.b32.xlu0 %v1366_v25, %s1400_s3 }
0x1244   :  { %v648_v26 = vpop.permute.xlu2 %647 }
0x1245   :  { %650 = vst.msk [vmem:[#allocation5] sm:$0xff] %vm129_vm0, %v648_v26 }
0x1246   :  { %752 = vst.msk [vmem:[#allocation5] sm:$0xff] %vm129_vm0, %v1399_v3 }
0x124d   :  { %v784_v33 = vld [vmem:[#allocation5] sm:$0xff] }
0x1263   :  { %v643_v27 = vpop.permute.xlu0 %642 }
0x1264   :  { %v645_v28 = vmul.f32 %v643_v27, %v623_v7 }
0x1266   :  { %652 = vrot.lane.b32.xlu1 %v645_v28, %s1401_s23 }
0x126e   :  { %786 = vrot.lane.b32.xlu1 %v784_v33, %s1401_s23 }
0x12d8   :  { %v653_v34 = vpop.permute.xlu1 %652 }
0x12d9   :  { %655 = vst.msk [vmem:[#allocation4] sm:$0xff] %vm129_vm0, %v653_v34 }
0x12da   :  { %657 = vst.msk [vmem:[#allocation3 + $0x38] sm:$0xff] %vm129_vm0, %v653_v34 }
0x12db   :  { %751 = vst.msk [vmem:[#allocation4] sm:$0xff] %vm129_vm0, %v1399_v3  ;;  %v715_v3 = vpop.f32.mrf.mxu3 }
0x12dc   :  { %v716_v38 = vadd.f32 %v1748_v37, %v715_v3 }
0x12e0   :  { %v787_v49 = vpop.permute.xlu1 %786 }
0x12e1   :  { %v665_v35 = vld [vmem:[#allocation3 + $0x38] sm:$0xff] }
0x12e2   :  { %1318 = vmatmul.msk.f32.gmra.mxu3 %vm129_vm0, %v665_v35  ;;  %v753_v36 = vld [vmem:[#allocation4] sm:$0xff] }
0x12e3   :  { %1319 = vmatmul.msk.f32.vlgmr.msrb.gmra.mxu1 %vm129_vm0, %v753_v36  ;;  %v718_v60 = vpop.f32.mrf.mxu3 }
0x12e4   :  { %1022 = vmatpush.msrb.mxu1 %v1701_v29  ;;  %v719_v61 = vadd.f32 %v1748_v37, %v718_v60 }
0x12e6   :  { %1023 = vmatpush.msrb.mxu1 %v1706_v30 }
0x12e8   :  { %1024 = vmatpush.msrb.mxu1 %v1713_v31 }
0x12ea   :  { %1025 = vmatpush.msrb.mxu1 %v1720_v32 }
0x12eb   :  { %v721_v10 = vpop.f32.mrf.mxu3 }
0x12ec   :  { %v722_v22 = vadd.f32 %v1748_v37, %v721_v10 }
0x1360   :  { %v775_v39 = vpop.f32.mrf.mxu1 }
0x1361   :  { %v776_v40 = vadd.f32 %v775_v39, %v716_v38 }
0x1363   :  { %v778_v41 = vmul.f32 0.5, %v776_v40 }
0x1365   :  { %v779_v42 = vsel %vm1518_vm4, %v776_v40, %v778_v41 }
0x1366   :  { %1367 = vtanh.f32 %v779_v42 }
0x136c   :  { %v1368_v43 = vpop.eup %1367 }
0x136d   :  { %v781_v44 = vadd.f32 1.0, %v1368_v43 }
0x136f   :  { %v782_v45 = vmul.f32 0.5, %v781_v44 }
0x1371   :  { %v783_v46 = vsel %vm1518_vm4, %v1368_v43, %v782_v45 }
0x1372   :  { %791 = vrot.lane.b32.xlu0 %v783_v46, %s1400_s3  ;;  %v789_v50 = vmul.f32 %v787_v49, %v783_v46 }
0x13e4   :  { %v792_v47 = vpop.permute.xlu0 %791 }
0x13e5   :  { %v794_v48 = vmul.f32 %v792_v47, %v783_v46 }
0x13e7   :  { %796 = vrot.lane.b32.xlu2 %v794_v48, %s1401_s23  ;;  %v724_v48 = vpop.f32.mrf.mxu3 }
0x13e8   :  { %v725_v49 = vadd.f32 %v1748_v37, %v724_v48 }
0x1441   :  { %v797_v51 = vpop.permute.xlu2 %796 }
0x1442   :  { %v799_v52 = vadd.f32 %v797_v51, %v789_v50 }
0x1444   :  { %1369 = vtanh.f32 %v799_v52  ;;  %807 = vrot.lane.b32.xlu2 %v799_v52, %s1402_s24 }
0x144a   :  { %v1370_v53 = vpop.eup %1369 }
0x144b   :  { %802 = vrot.lane.b32.xlu0 %v1370_v53, %s1400_s3 }
0x149e   :  { %v808_v54 = vpop.permute.xlu2 %807 }
0x149f   :  { %810 = vst.msk [vmem:[#allocation5] sm:$0xff] %vm129_vm0, %v808_v54 }
0x14a6   :  { %v847_v57 = vld [vmem:[#allocation5] sm:$0xff] }
0x14bd   :  { %v803_v55 = vpop.permute.xlu0 %802 }
0x14be   :  { %v805_v56 = vmul.f32 %v803_v55, %v783_v46 }
0x14c0   :  { %812 = vrot.lane.b32.xlu1 %v805_v56, %s1401_s23 }
0x14c8   :  { %849 = vrot.lane.b32.xlu1 %v847_v57, %s1401_s23 }
0x1532   :  { %v813_v58 = vpop.permute.xlu1 %812 }
0x1533   :  { %815 = vst.msk [vmem:[#allocation4] sm:$0xff] %vm129_vm0, %v813_v58 }
0x153a   :  { %v816_v59 = vld [vmem:[#allocation4] sm:$0xff]  ;;  %v850_v14 = vpop.permute.xlu1 %849 }
0x153b   :  { %1320 = vmatmul.msk.f32.vlgmr.msra.gmra.mxu2 %vm129_vm0, %v816_v59 }
0x153c   :  { %1085 = vmatpush.msra.mxu2 %v1701_v29 }
0x153e   :  { %1086 = vmatpush.msra.mxu2 %v1706_v30 }
0x1540   :  { %1087 = vmatpush.msra.mxu2 %v1713_v31 }
0x1542   :  { %1088 = vmatpush.msra.mxu2 %v1720_v32 }
0x15be   :  { %v838_v62 = vpop.f32.mrf.mxu2 }
0x15bf   :  { %v839_v63 = vadd.f32 %v838_v62, %v719_v61 }
0x15c1   :  { %v841_v1 = vmul.f32 0.5, %v839_v63 }
0x15c3   :  { %v842_v4 = vsel %vm1518_vm4, %v839_v63, %v841_v1 }
0x15c4   :  { %1371 = vtanh.f32 %v842_v4 }
0x15ca   :  { %v1372_v5 = vpop.eup %1371 }
0x15cb   :  { %v844_v8 = vadd.f32 1.0, %v1372_v5 }
0x15cd   :  { %v845_v9 = vmul.f32 0.5, %v844_v8  ;;  %v727_v8 = vpop.f32.mrf.mxu3 }
0x15cf   :  { %v846_v11 = vsel %vm1518_vm4, %v1372_v5, %v845_v9  ;;  %v728_v9 = vadd.f32 %v1748_v37, %v727_v8 }
0x15d0   :  { %854 = vrot.lane.b32.xlu0 %v846_v11, %s1400_s3  ;;  %v852_v15 = vmul.f32 %v850_v14, %v846_v11 }
0x1642   :  { %v855_v12 = vpop.permute.xlu0 %854 }
0x1643   :  { %v857_v13 = vmul.f32 %v855_v12, %v846_v11 }
0x1645   :  { %859 = vrot.lane.b32.xlu2 %v857_v13, %s1401_s23 }
0x169f   :  { %v860_v17 = vpop.permute.xlu2 %859 }
0x16a0   :  { %v862_v18 = vadd.f32 %v860_v17, %v852_v15 }
0x16a2   :  { %1373 = vtanh.f32 %v862_v18  ;;  %870 = vrot.lane.b32.xlu2 %v862_v18, %s1402_s24 }
0x16a8   :  { %v1374_v19 = vpop.eup %1373 }
0x16a9   :  { %865 = vrot.lane.b32.xlu0 %v1374_v19, %s1400_s3 }
0x16fc   :  { %v871_v0 = vpop.permute.xlu2 %870 }
0x16fd   :  { %873 = vst.msk [vmem:[#allocation5] sm:$0xff] %vm129_vm0, %v871_v0 }
0x1704   :  { %v910_v7 = vld [vmem:[#allocation5] sm:$0xff] }
0x171b   :  { %v866_v2 = vpop.permute.xlu0 %865 }
0x171c   :  { %v868_v6 = vmul.f32 %v866_v2, %v846_v11 }
0x171e   :  { %875 = vrot.lane.b32.xlu1 %v868_v6, %s1401_s23 }
0x1726   :  { %912 = vrot.lane.b32.xlu1 %v910_v7, %s1401_s23 }
0x1790   :  { %v876_v20 = vpop.permute.xlu1 %875 }
0x1791   :  { %878 = vst.msk [vmem:[#allocation4] sm:$0xff] %vm129_vm0, %v876_v20 }
0x1798   :  { %v879_v21 = vld [vmem:[#allocation4] sm:$0xff]  ;;  %v913_v3 = vpop.permute.xlu1 %912 }
0x1799   :  { %1321 = vmatmul.msk.f32.vlgmr.msra.gmra.mxu1 %vm129_vm0, %v879_v21 }
0x179a   :  { %1148 = vmatpush.msra.mxu1 %v1701_v29 }
0x179c   :  { %1149 = vmatpush.msra.mxu1 %v1706_v30 }
0x179e   :  { %1150 = vmatpush.msra.mxu1 %v1713_v31 }
0x17a0   :  { %1151 = vmatpush.msra.mxu1 %v1720_v32 }
0x1816   :  { %v901_v23 = vpop.f32.mrf.mxu1 }
0x1817   :  { %v902_v24 = vadd.f32 %v901_v23, %v722_v22 }
0x1819   :  { %v904_v25 = vmul.f32 0.5, %v902_v24 }
0x181b   :  { %v905_v26 = vsel %vm1518_vm4, %v902_v24, %v904_v25 }
0x181c   :  { %1375 = vtanh.f32 %v905_v26 }
0x1822   :  { %v1376_v27 = vpop.eup %1375 }
0x1823   :  { %v907_v28 = vadd.f32 1.0, %v1376_v27 }
0x1825   :  { %v908_v33 = vmul.f32 0.5, %v907_v28  ;;  %v730_v28 = vpop.f32.mrf.mxu3 }
0x1827   :  { %v909_v34 = vsel %vm1518_vm4, %v1376_v27, %v908_v33  ;;  %v731_v33 = vadd.f32 %v1748_v37, %v730_v28 }
0x1828   :  { %917 = vrot.lane.b32.xlu0 %v909_v34, %s1400_s3  ;;  %v915_v38 = vmul.f32 %v913_v3, %v909_v34 }
0x189a   :  { %v918_v35 = vpop.permute.xlu0 %917 }
0x189b   :  { %v920_v36 = vmul.f32 %v918_v35, %v909_v34 }
0x189d   :  { %922 = vrot.lane.b32.xlu2 %v920_v36, %s1401_s23 }
0x18f7   :  { %v923_v39 = vpop.permute.xlu2 %922 }
0x18f8   :  { %v925_v40 = vadd.f32 %v923_v39, %v915_v38 }
0x18fa   :  { %1377 = vtanh.f32 %v925_v40  ;;  %933 = vrot.lane.b32.xlu2 %v925_v40, %s1402_s24 }
0x1900   :  { %v1378_v41 = vpop.eup %1377 }
0x1901   :  { %928 = vrot.lane.b32.xlu0 %v1378_v41, %s1400_s3 }
0x1954   :  { %v934_v42 = vpop.permute.xlu2 %933 }
0x1955   :  { %936 = vst.msk [vmem:[#allocation5] sm:$0xff] %vm129_vm0, %v934_v42 }
0x195c   :  { %v973_v45 = vld [vmem:[#allocation5] sm:$0xff] }
0x1973   :  { %v929_v43 = vpop.permute.xlu0 %928 }
0x1974   :  { %v931_v44 = vmul.f32 %v929_v43, %v909_v34 }
0x1976   :  { %938 = vrot.lane.b32.xlu1 %v931_v44, %s1401_s23 }
0x197e   :  { %975 = vrot.lane.b32.xlu1 %v973_v45, %s1401_s23 }
0x19e8   :  { %v939_v46 = vpop.permute.xlu1 %938 }
0x19e9   :  { %941 = vst.msk [vmem:[#allocation4] sm:$0xff] %vm129_vm0, %v939_v46 }
0x19f0   :  { %v942_v47 = vld [vmem:[#allocation4] sm:$0xff] }
0x19f1   :  { %1322 = vmatmul.msk.f32.vlgmr.msrb.gmra.mxu2 %vm129_vm0, %v942_v47 }
0x19f2   :  { %1211 = vmatpush.msrb.mxu2 %v1701_v29 }
0x19f4   :  { %1212 = vmatpush.msrb.mxu2 %v1706_v30 }
0x19f6   :  { %1213 = vmatpush.msrb.mxu2 %v1713_v31 }
0x19f8   :  { %1214 = vmatpush.msrb.mxu2 %v1720_v32  ;;  %v976_v32 = vpop.permute.xlu1 %975 }
0x1a74   :  { %v964_v50 = vpop.f32.mrf.mxu2 }
0x1a75   :  { %v965_v51 = vadd.f32 %v964_v50, %v725_v49 }
0x1a77   :  { %v967_v52 = vmul.f32 0.5, %v965_v51 }
0x1a79   :  { %v968_v53 = vsel %vm1518_vm4, %v965_v51, %v967_v52 }
0x1a7a   :  { %1379 = vtanh.f32 %v968_v53 }
0x1a80   :  { %v1380_v54 = vpop.eup %1379 }
0x1a81   :  { %v970_v55 = vadd.f32 1.0, %v1380_v54 }
0x1a83   :  { %v971_v56 = vmul.f32 0.5, %v970_v55  ;;  %v733_v55 = vpop.f32.mrf.mxu3 }
0x1a85   :  { %v972_v29 = vsel %vm1518_vm4, %v1380_v54, %v971_v56  ;;  %v734_v56 = vadd.f32 %v1748_v37, %v733_v55 }
0x1a86   :  { %980 = vrot.lane.b32.xlu0 %v972_v29, %s1400_s3  ;;  %v978_v57 = vmul.f32 %v976_v32, %v972_v29 }
0x1af8   :  { %v981_v30 = vpop.permute.xlu0 %980 }
0x1af9   :  { %v983_v31 = vmul.f32 %v981_v30, %v972_v29 }
0x1afb   :  { %985 = vrot.lane.b32.xlu2 %v983_v31, %s1401_s23 }
0x1b55   :  { %v986_v58 = vpop.permute.xlu2 %985 }
0x1b56   :  { %v988_v59 = vadd.f32 %v986_v58, %v978_v57 }
0x1b58   :  { %1381 = vtanh.f32 %v988_v59  ;;  %996 = vrot.lane.b32.xlu2 %v988_v59, %s1402_s24 }
0x1b5e   :  { %v1382_v60 = vpop.eup %1381 }
0x1b5f   :  { %991 = vrot.lane.b32.xlu0 %v1382_v60, %s1400_s3 }
0x1bb2   :  { %v997_v61 = vpop.permute.xlu2 %996 }
0x1bb3   :  { %999 = vst.msk [vmem:[#allocation5] sm:$0xff] %vm129_vm0, %v997_v61 }
0x1bba   :  { %v1036_v1 = vld [vmem:[#allocation5] sm:$0xff] }
0x1bd1   :  { %v992_v62 = vpop.permute.xlu0 %991 }
0x1bd2   :  { %v994_v63 = vmul.f32 %v992_v62, %v972_v29 }
0x1bd4   :  { %1001 = vrot.lane.b32.xlu1 %v994_v63, %s1401_s23 }
0x1bdc   :  { %1038 = vrot.lane.b32.xlu1 %v1036_v1, %s1401_s23 }
0x1c46   :  { %v1002_v4 = vpop.permute.xlu1 %1001 }
0x1c47   :  { %1004 = vst.msk [vmem:[#allocation4] sm:$0xff] %vm129_vm0, %v1002_v4 }
0x1c4e   :  { %v1005_v5 = vld [vmem:[#allocation4] sm:$0xff]  ;;  %v1039_v6 = vpop.permute.xlu1 %1038 }
0x1c4f   :  { %1323 = vmatmul.msk.f32.vlgmr.msrb.gmra.mxu1 %vm129_vm0, %v1005_v5 }
0x1ccc   :  { %v1027_v11 = vpop.f32.mrf.mxu1 }
0x1ccd   :  { %v1028_v12 = vadd.f32 %v1027_v11, %v728_v9 }
0x1ccf   :  { %v1030_v13 = vmul.f32 0.5, %v1028_v12 }
0x1cd1   :  { %v1031_v14 = vsel %vm1518_vm4, %v1028_v12, %v1030_v13 }
0x1cd2   :  { %1383 = vtanh.f32 %v1031_v14 }
0x1cd8   :  { %v1384_v15 = vpop.eup %1383 }
0x1cd9   :  { %v1033_v17 = vadd.f32 1.0, %v1384_v15 }
0x1cdb   :  { %v1034_v18 = vmul.f32 0.5, %v1033_v17  ;;  %v736_v17 = vpop.f32.mrf.mxu3 }
0x1cdd   :  { %v1035_v19 = vsel %vm1518_vm4, %v1384_v15, %v1034_v18  ;;  %v737_v18 = vadd.f32 %v1748_v37, %v736_v17 }
0x1cde   :  { %1043 = vrot.lane.b32.xlu0 %v1035_v19, %s1400_s3  ;;  %v1041_v7 = vmul.f32 %v1039_v6, %v1035_v19 }
0x1d50   :  { %v1044_v0 = vpop.permute.xlu0 %1043 }
0x1d51   :  { %v1046_v2 = vmul.f32 %v1044_v0, %v1035_v19 }
0x1d53   :  { %1048 = vrot.lane.b32.xlu2 %v1046_v2, %s1401_s23 }
0x1dad   :  { %v1049_v20 = vpop.permute.xlu2 %1048 }
0x1dae   :  { %v1051_v21 = vadd.f32 %v1049_v20, %v1041_v7 }
0x1db0   :  { %1385 = vtanh.f32 %v1051_v21  ;;  %1059 = vrot.lane.b32.xlu2 %v1051_v21, %s1402_s24 }
0x1db6   :  { %v1386_v10 = vpop.eup %1385 }
0x1db7   :  { %1054 = vrot.lane.b32.xlu0 %v1386_v10, %s1400_s3 }
0x1e0a   :  { %v1060_v22 = vpop.permute.xlu2 %1059 }
0x1e0b   :  { %1062 = vst.msk [vmem:[#allocation5] sm:$0xff] %vm129_vm0, %v1060_v22 }
0x1e12   :  { %v1099_v25 = vld [vmem:[#allocation5] sm:$0xff] }
0x1e29   :  { %v1055_v23 = vpop.permute.xlu0 %1054 }
0x1e2a   :  { %v1057_v24 = vmul.f32 %v1055_v23, %v1035_v19 }
0x1e2c   :  { %1064 = vrot.lane.b32.xlu1 %v1057_v24, %s1401_s23 }
0x1e34   :  { %1101 = vrot.lane.b32.xlu1 %v1099_v25, %s1401_s23 }
0x1e9e   :  { %v1065_v26 = vpop.permute.xlu1 %1064 }
0x1e9f   :  { %1067 = vst.msk [vmem:[#allocation4] sm:$0xff] %vm129_vm0, %v1065_v26 }
0x1ea6   :  { %v1068_v27 = vld [vmem:[#allocation4] sm:$0xff]  ;;  %v1102_v44 = vpop.permute.xlu1 %1101 }
0x1ea7   :  { %1324 = vmatmul.msk.f32.vlgmr.msra.gmra.mxu2 %vm129_vm0, %v1068_v27 }
0x1f2a   :  { %v1090_v34 = vpop.f32.mrf.mxu2 }
0x1f2b   :  { %v1091_v35 = vadd.f32 %v1090_v34, %v731_v33  ;;  %v1261_v34 = vld [vmem:[%s1899_s7 + $0x18] sm:$0xff] }
0x1f2c   :  { %1281 = vmatpush.msrb.mxu1 %v1261_v34 }
0x1f2d   :  { %v1093_v36 = vmul.f32 0.5, %v1091_v35 }
0x1f2f   :  { %v1094_v3 = vsel %vm1518_vm4, %v1091_v35, %v1093_v36  ;;  %v1260_v35 = vld [vmem:[%s1899_s7 + $0x10] sm:$0xff]  ;;  %v1259_v36 = vld [vmem:[%s1899_s7 + $0x8] sm:$0xff] }
0x1f30   :  { %1387 = vtanh.f32 %v1094_v3  ;;  %1282 = vmatpush.msrb.mxu1 %v1260_v35  ;;  %v1258_v3 = vld [vmem:[%s1899_s7] sm:$0xff] }
0x1f32   :  { %1283 = vmatpush.msrb.mxu1 %v1259_v36 }
0x1f34   :  { %1284 = vmatpush.msrb.mxu1 %v1258_v3 }
0x1f36   :  { %v1388_v38 = vpop.eup %1387 }
0x1f37   :  { %v1096_v39 = vadd.f32 1.0, %v1388_v38 }
0x1f39   :  { %v1097_v40 = vmul.f32 0.5, %v1096_v39 }
0x1f3b   :  { %v1098_v41 = vsel %vm1518_vm4, %v1388_v38, %v1097_v40  ;;  %v1334_v40 = vld [vmem:[%s1898_s8] ss:$0 sm:$0xff] }
0x1f3c   :  { %1106 = vrot.lane.b32.xlu0 %v1098_v41, %s1400_s3  ;;  %v1104_v45 = vmul.f32 %v1102_v44, %v1098_v41 }
0x1fae   :  { %v1107_v42 = vpop.permute.xlu0 %1106 }
0x1faf   :  { %v1109_v43 = vmul.f32 %v1107_v42, %v1098_v41 }
0x1fb1   :  { %1111 = vrot.lane.b32.xlu2 %v1109_v43, %s1401_s23 }
0x200b   :  { %v1112_v46 = vpop.permute.xlu2 %1111 }
0x200c   :  { %v1114_v47 = vadd.f32 %v1112_v46, %v1104_v45 }
0x200e   :  { %1389 = vtanh.f32 %v1114_v47  ;;  %1122 = vrot.lane.b32.xlu2 %v1114_v47, %s1402_s24 }
0x2014   :  { %v1390_v48 = vpop.eup %1389 }
0x2015   :  { %1117 = vrot.lane.b32.xlu0 %v1390_v48, %s1400_s3 }
0x2068   :  { %v1123_v49 = vpop.permute.xlu2 %1122 }
0x2069   :  { %1125 = vst.msk [vmem:[#allocation5] sm:$0xff] %vm129_vm0, %v1123_v49 }
0x2070   :  { %v1162_v52 = vld [vmem:[#allocation5] sm:$0xff] }
0x2087   :  { %v1118_v50 = vpop.permute.xlu0 %1117 }
0x2088   :  { %v1120_v51 = vmul.f32 %v1118_v50, %v1098_v41 }
0x208a   :  { %1127 = vrot.lane.b32.xlu1 %v1120_v51, %s1401_s23 }
0x2092   :  { %1164 = vrot.lane.b32.xlu1 %v1162_v52, %s1401_s23 }
0x20fc   :  { %v1128_v53 = vpop.permute.xlu1 %1127 }
0x20fd   :  { %1130 = vst.msk [vmem:[#allocation4] sm:$0xff] %vm129_vm0, %v1128_v53 }
0x2104   :  { %v1131_v54 = vld [vmem:[#allocation4] sm:$0xff]  ;;  %v1165_v63 = vpop.permute.xlu1 %1164 }
0x2105   :  { %1325 = vmatmul.msk.f32.vlgmr.msra.gmra.mxu1 %vm129_vm0, %v1131_v54 }
0x2182   :  { %v1153_v29 = vpop.f32.mrf.mxu1 }
0x2183   :  { %v1154_v30 = vadd.f32 %v1153_v29, %v734_v56 }
0x2185   :  { %v1156_v31 = vmul.f32 0.5, %v1154_v30 }
0x2187   :  { %v1157_v32 = vsel %vm1518_vm4, %v1154_v30, %v1156_v31 }
0x2188   :  { %1391 = vtanh.f32 %v1157_v32 }
0x218e   :  { %v1392_v57 = vpop.eup %1391 }
0x218f   :  { %v1159_v58 = vadd.f32 1.0, %v1392_v57 }
0x2191   :  { %v1160_v59 = vmul.f32 0.5, %v1159_v58 }
0x2193   :  { %v1161_v60 = vsel %vm1518_vm4, %v1392_v57, %v1160_v59 }
0x2194   :  { %1169 = vrot.lane.b32.xlu0 %v1161_v60, %s1400_s3  ;;  %v1167_v1 = vmul.f32 %v1165_v63, %v1161_v60 }
0x2206   :  { %v1170_v61 = vpop.permute.xlu0 %1169 }
0x2207   :  { %v1172_v62 = vmul.f32 %v1170_v61, %v1161_v60 }
0x2209   :  { %1174 = vrot.lane.b32.xlu2 %v1172_v62, %s1401_s23 }
0x2263   :  { %v1175_v4 = vpop.permute.xlu2 %1174 }
0x2264   :  { %v1177_v5 = vadd.f32 %v1175_v4, %v1167_v1 }
0x2266   :  { %1393 = vtanh.f32 %v1177_v5  ;;  %1185 = vrot.lane.b32.xlu2 %v1177_v5, %s1402_s24 }
0x226c   :  { %v1394_v8 = vpop.eup %1393 }
0x226d   :  { %1180 = vrot.lane.b32.xlu0 %v1394_v8, %s1400_s3 }
0x22c0   :  { %v1186_v9 = vpop.permute.xlu2 %1185 }
0x22c1   :  { %1188 = vst.msk [vmem:[#allocation5] sm:$0xff] %vm129_vm0, %v1186_v9 }
0x22c8   :  { %v1225_v13 = vld [vmem:[#allocation5] sm:$0xff] }
0x22df   :  { %v1181_v11 = vpop.permute.xlu0 %1180 }
0x22e0   :  { %v1183_v12 = vmul.f32 %v1181_v11, %v1161_v60 }
0x22e2   :  { %1190 = vrot.lane.b32.xlu1 %v1183_v12, %s1401_s23 }
0x22ea   :  { %1227 = vrot.lane.b32.xlu1 %v1225_v13, %s1401_s23 }
0x2354   :  { %v1191_v14 = vpop.permute.xlu1 %1190 }
0x2355   :  { %1193 = vst.msk [vmem:[#allocation4] sm:$0xff] %vm129_vm0, %v1191_v14 }
0x235c   :  { %v1194_v15 = vld [vmem:[#allocation4] sm:$0xff]  ;;  %v1228_v37 = vpop.permute.xlu1 %1227 }
0x235d   :  { %1326 = vmatmul.msk.f32.vlgmr.msrb.gmra.mxu2 %vm129_vm0, %v1194_v15 }
0x23e0   :  { %v1216_v19 = vpop.f32.mrf.mxu2 }
0x23e1   :  { %v1217_v0 = vadd.f32 %v1216_v19, %v737_v18 }
0x23e3   :  { %v1219_v2 = vmul.f32 0.5, %v1217_v0 }
0x23e5   :  { %v1220_v6 = vsel %vm1518_vm4, %v1217_v0, %v1219_v2 }
0x23e6   :  { %1395 = vtanh.f32 %v1220_v6 }
0x23ec   :  { %v1396_v7 = vpop.eup %1395 }
0x23ed   :  { %v1222_v20 = vadd.f32 1.0, %v1396_v7 }
0x23ef   :  { %v1223_v21 = vmul.f32 0.5, %v1222_v20 }
0x23f1   :  { %v1224_v10 = vsel %vm1518_vm4, %v1396_v7, %v1223_v21 }
0x23f2   :  { %1232 = vrot.lane.b32.xlu0 %v1224_v10, %s1400_s3  ;;  %v1230_v24 = vmul.f32 %v1228_v37, %v1224_v10 }
0x2464   :  { %v1233_v22 = vpop.permute.xlu0 %1232 }
0x2465   :  { %v1235_v23 = vmul.f32 %v1233_v22, %v1224_v10 }
0x2467   :  { %1237 = vrot.lane.b32.xlu2 %v1235_v23, %s1401_s23 }
0x24c1   :  { %v1238_v25 = vpop.permute.xlu2 %1237 }
0x24c2   :  { %v1240_v26 = vadd.f32 %v1238_v25, %v1230_v24 }
0x24c4   :  { %1397 = vtanh.f32 %v1240_v26  ;;  %1248 = vrot.lane.b32.xlu2 %v1240_v26, %s1402_s24 }
0x24ca   :  { %v1398_v27 = vpop.eup %1397 }
0x24cb   :  { %1243 = vrot.lane.b32.xlu0 %v1398_v27, %s1400_s3 }
0x251e   :  { %v1249_v28 = vpop.permute.xlu2 %1248 }
0x251f   :  { %1251 = vst.msk [vmem:[#allocation5] sm:$0xff] %vm129_vm0, %v1249_v28 }
0x253d   :  { %v1244_v16 = vpop.permute.xlu0 %1243 }
0x253e   :  { %v1246_v33 = vmul.f32 %v1244_v16, %v1224_v10 }
0x2540   :  { %1253 = vrot.lane.b32.xlu1 %v1246_v33, %s1401_s23 }
0x25b2   :  { %v1254_v38 = vpop.permute.xlu1 %1253 }
0x25b3   :  { %1256 = vst.msk [vmem:[#allocation4] sm:$0xff] %vm129_vm0, %v1254_v38 }
0x25ba   :  { %v1257_v39 = vld [vmem:[#allocation4] sm:$0xff] }
0x25bb   :  { %1327 = vmatmul.msk.f32.vlgmr.msrb.gmra.mxu1 %vm129_vm0, %v1257_v39 }
0x2638   :  { %v1286_v41 = vpop.f32.mrf.mxu1 }
0x2639   :  { %v1287_v42 = vadd.f32 %v1334_v40, %v1286_v41 }
0x263b   :  { %1290 = vst.msk [vmem:[%s1900_s9] sm:$0xff] %vm1289_vm5, %v1287_v42 }

</bundles_post_ra>
